<compile_context>
chip_gen: v7x
topology: tpu7x:2x2x1
jax: 0.10.0
libtpu: 0.0.40
codegen_flags: <defaults>
</compile_context>

<pallas_src>
import jax
import jax.numpy as jnp
from jax.experimental import pallas as pl
from jax.experimental.pallas import tpu as pltpu

IN_DIM = 32 * 32 * 3   # 3072  (multiple of 128 -> lane-dense in/out blocks)
HID = 100
HID_PAD = 128          # pad hidden dim to a full lane width
MAX_TILE_B = 256       # rows per grid step for large batches (full MXU M-tile)


def _mlp_kernel(x_ref, w1_ref, b1_ref, w2_ref, b2_ref,
                w3_ref, b3_ref, w4_ref, b4_ref, o_ref):
    # x_ref: (TILE_B, 3072) f32 (cast to bf16 in-kernel: VPU is idle, and it
    # removes a wrapper-side XLA cast pass over HBM); weights bf16 and
    # VMEM-resident across grid steps (constant index_maps); biases f32;
    # output bf16 (halves writeback traffic).
    x = x_ref[...].astype(jnp.bfloat16)

    h = jnp.dot(x, w1_ref[...], preferred_element_type=jnp.float32) + b1_ref[...]
    h = jnp.maximum(h, 0.0).astype(jnp.bfloat16)                     # ReLU

    h = jnp.dot(h, w2_ref[...], preferred_element_type=jnp.float32) + b2_ref[...]
    h = jnp.maximum(h, 0.0).astype(jnp.bfloat16)                     # ReLU

    h = jnp.dot(h, w3_ref[...], preferred_element_type=jnp.float32) + b3_ref[...]
    h = jnp.maximum(h, 0.0).astype(jnp.bfloat16)                     # ReLU

    y = jnp.dot(h, w4_ref[...], preferred_element_type=jnp.float32) + b4_ref[...]
    # Sigmoid: clamp so exp stays finite, exp -> EUP, approx reciprocal -> EUP.
    # Approx-rcp error (~2^-12) is far below the bf16 output quantization.
    yc = jnp.clip(y, -30.0, 30.0)
    s = pl.reciprocal(1.0 + jnp.exp(-yc), approx=True)
    o_ref[...] = s.astype(jnp.bfloat16)


def prepare_params(params):
    """ONE-TIME prep (hoisted out of the per-call path): pad HID 100->128 with
    zeros and cast weights to bf16 (biases stay f32). Cache and reuse the result."""
    w1, b1, w2, b2, w3, b3, w4, b4 = params
    p = HID_PAD - HID
    w1p = jnp.pad(w1, ((0, 0), (0, p))).astype(jnp.bfloat16)   # (3072, 128)
    b1p = jnp.pad(b1, ((0, 0), (0, p))).astype(jnp.float32)    # (1, 128)
    w2p = jnp.pad(w2, ((0, p), (0, p))).astype(jnp.bfloat16)   # (128, 128)
    b2p = jnp.pad(b2, ((0, 0), (0, p))).astype(jnp.float32)
    w3p = jnp.pad(w3, ((0, p), (0, p))).astype(jnp.bfloat16)
    b3p = jnp.pad(b3, ((0, 0), (0, p))).astype(jnp.float32)
    w4p = jnp.pad(w4, ((0, p), (0, 0))).astype(jnp.bfloat16)   # (128, 3072)
    b4p = b4.astype(jnp.float32)                               # (1, 3072)
    return w1p, b1p, w2p, b2p, w3p, b3p, w4p, b4p


def _pick_tile_b(batch):
    """Largest sublane-aligned tile up to MAX_TILE_B."""
    b8 = ((batch + 7) // 8) * 8
    return min(MAX_TILE_B, b8)


def net_forward_batched(x, prepped):
    """x: (B, 3072) float32. prepped = prepare_params(params) (cached).
    Returns (B, 3072) bfloat16."""
    B = x.shape[0]
    tile_b = _pick_tile_b(B)
    num_tiles = pl.cdiv(B, tile_b)
    b_pad = num_tiles * tile_b
    x = x.astype(jnp.float32)
    if b_pad != B:
        x = jnp.pad(x, ((0, b_pad - B), (0, 0)))

    const = lambda i: (0, 0)   # weights/biases: same block every step (VMEM-resident)
    out = pl.pallas_call(
        _mlp_kernel,
        out_shape=jax.ShapeDtypeStruct((b_pad, IN_DIM), jnp.bfloat16),
        grid_spec=pltpu.PrefetchScalarGridSpec(
            num_scalar_prefetch=0,
            grid=(num_tiles,),
            in_specs=[
                pl.BlockSpec((tile_b, IN_DIM), lambda i: (i, 0)),   # x tile (f32)
                pl.BlockSpec((IN_DIM, HID_PAD), const),             # W1
                pl.BlockSpec((1, HID_PAD), const),                  # b1
                pl.BlockSpec((HID_PAD, HID_PAD), const),            # W2
                pl.BlockSpec((1, HID_PAD), const),                  # b2
                pl.BlockSpec((HID_PAD, HID_PAD), const),            # W3
                pl.BlockSpec((1, HID_PAD), const),                  # b3
                pl.BlockSpec((HID_PAD, IN_DIM), const),             # W4
                pl.BlockSpec((1, IN_DIM), const),                   # b4
            ],
            out_specs=pl.BlockSpec((tile_b, IN_DIM), lambda i: (i, 0)),
        ),
        compiler_params=pltpu.CompilerParams(
            dimension_semantics=("parallel",),
            vmem_limit_bytes=48 * 1024 * 1024,   # 256-row tiles fit on v5e too
        ),
    )(x, *prepped)
    return out[:B]


def net_forward(x, prepped):
    """Single-image forward matching Net.forward: (1, 3072) -> (32, 32, 3)."""
    out = net_forward_batched(x.reshape(1, IN_DIM), prepped)
    return out.reshape((32, 32, 3))


def init_params(key):
    """Deterministic init matching nn.Linear shapes (stored as (in, out))."""
    dims = [(IN_DIM, HID), (HID, HID), (HID, HID), (HID, IN_DIM)]
    params = []
    for fan_in, fan_out in dims:
        kw, kb, key = jax.random.split(key, 3)
        bound = 1.0 / jnp.sqrt(fan_in)
        w = jax.random.uniform(kw, (fan_in, fan_out), jnp.float32, -bound, bound)
        b = jax.random.uniform(kb, (1, fan_out), jnp.float32, -bound, bound)
        params += [w, b]
    return tuple(params)


def _reference_bf16(x, params):
    """Emulates the kernel's matmul numerics: bf16 inputs, f32 accumulation."""
    w1, b1, w2, b2, w3, b3, w4, b4 = params
    dot = lambda a, w: jnp.dot(a.astype(jnp.bfloat16), w.astype(jnp.bfloat16),
                               preferred_element_type=jnp.float32)
    h = jnp.maximum(dot(x, w1) + b1, 0.0)
    h = jnp.maximum(dot(h, w2) + b2, 0.0)
    h = jnp.maximum(dot(h, w3) + b3, 0.0)
    return jax.nn.sigmoid(dot(h, w4) + b4)


def _reference_f32(x, params):
    w1, b1, w2, b2, w3, b3, w4, b4 = params
    h = jnp.maximum(x @ w1 + b1, 0.0)
    h = jnp.maximum(h @ w2 + b2, 0.0)
    h = jnp.maximum(h @ w3 + b3, 0.0)
    return jax.nn.sigmoid(h @ w4 + b4)


if __name__ == "__main__":
    key = jax.random.PRNGKey(0)
    kx, kp, kb, kc = jax.random.split(key, 4)
    params = init_params(kp)
    prepped = prepare_params(params)          # hoisted: prepared ONCE, reused below

    fwd_single = jax.jit(net_forward)
    fwd_batched = jax.jit(net_forward_batched)

    # Single image, matching Net.forward semantics: (1, 3072) -> (32, 32, 3).
    x = jax.random.normal(kx, (1, IN_DIM), jnp.float32)
    out = jax.block_until_ready(fwd_single(x, prepped))
    assert out.shape == (32, 32, 3), out.shape
    out_f32 = out.astype(jnp.float32)
    ref = _reference_bf16(x, params).reshape((32, 32, 3))
    assert jnp.allclose(out_f32, ref, atol=5e-3, rtol=5e-3), "mismatch vs bf16 reference"
    ref32 = _reference_f32(x, params).reshape((32, 32, 3))
    assert jnp.allclose(out_f32, ref32, atol=5e-2, rtol=5e-2), "mismatch vs f32 reference"

    # Small batched path (tile adapts down to 16 rows).
    xb = jax.random.normal(kb, (16, IN_DIM), jnp.float32)
    outb = jax.block_until_ready(fwd_batched(xb, prepped))
    refb = _reference_bf16(xb, params)
    assert jnp.allclose(outb.astype(jnp.float32), refb, atol=5e-3, rtol=5e-3), \
        "batched mismatch"

    # Larger batch: exercises the 256-row tile, batch padding (300 -> 512) and
    # the 2-step parallel grid with VMEM-resident weights.
    xc = jax.random.normal(kc, (300, IN_DIM), jnp.float32)
    outc = jax.block_until_ready(fwd_batched(xc, prepped))
    refc = _reference_bf16(xc, params)
    assert outc.shape == (300, IN_DIM)
    assert jnp.allclose(outc.astype(jnp.float32), refc, atol=5e-3, rtol=5e-3), \
        "large-batch mismatch"

    print("KERNEL_OK")
</pallas_src>

<mosaic_0001>
module attributes {stable_mosaic.version = 11 : i64} {
  func.func @_mlp_kernel(%arg0: i32, %arg1: memref<8x3072xf32, #tpu.memory_space<vmem>>, %arg2: memref<3072x128xbf16, #tpu.memory_space<vmem>>, %arg3: memref<1x128xf32, #tpu.memory_space<vmem>>, %arg4: memref<128x128xbf16, #tpu.memory_space<vmem>>, %arg5: memref<1x128xf32, #tpu.memory_space<vmem>>, %arg6: memref<128x128xbf16, #tpu.memory_space<vmem>>, %arg7: memref<1x128xf32, #tpu.memory_space<vmem>>, %arg8: memref<128x3072xbf16, #tpu.memory_space<vmem>>, %arg9: memref<1x3072xf32, #tpu.memory_space<vmem>>, %arg10: memref<8x3072xbf16, #tpu.memory_space<vmem>>) attributes {dimension_semantics = [#tpu.dimension_semantics<parallel>], iteration_bounds = array<i64: 1>, scalar_prefetch = 0 : i64, scratch_operands = 0 : i64, tpu.core_type = #tpu.core_type<tc>, window_params = [{transform_indices = @transform_0, window_bounds = array<i64: 8, 3072>}, {pipeline_mode = #tpu.pipeline_mode<synchronous>, transform_indices = @transform_1, window_bounds = array<i64: 3072, 128>}, {pipeline_mode = #tpu.pipeline_mode<synchronous>, transform_indices = @transform_2, window_bounds = array<i64: 1, 128>}, {pipeline_mode = #tpu.pipeline_mode<synchronous>, transform_indices = @transform_3, window_bounds = array<i64: 128, 128>}, {pipeline_mode = #tpu.pipeline_mode<synchronous>, transform_indices = @transform_4, window_bounds = array<i64: 1, 128>}, {pipeline_mode = #tpu.pipeline_mode<synchronous>, transform_indices = @transform_5, window_bounds = array<i64: 128, 128>}, {pipeline_mode = #tpu.pipeline_mode<synchronous>, transform_indices = @transform_6, window_bounds = array<i64: 1, 128>}, {pipeline_mode = #tpu.pipeline_mode<synchronous>, transform_indices = @transform_7, window_bounds = array<i64: 128, 3072>}, {pipeline_mode = #tpu.pipeline_mode<synchronous>, transform_indices = @transform_8, window_bounds = array<i64: 1, 3072>}, {transform_indices = @transform_9, window_bounds = array<i64: 8, 3072>}]} {
    %c0 = arith.constant 0 : index
    %c0_0 = arith.constant 0 : index
    %0 = vector.load %arg1[%c0, %c0_0] : memref<8x3072xf32, #tpu.memory_space<vmem>>, vector<8x3072xf32>
    %1 = arith.truncf %0 : vector<8x3072xf32> to vector<8x3072xbf16>
    %c0_1 = arith.constant 0 : index
    %c0_2 = arith.constant 0 : index
    %2 = vector.load %arg2[%c0_1, %c0_2] : memref<3072x128xbf16, #tpu.memory_space<vmem>>, vector<3072x128xbf16>
    %cst = arith.constant dense<0.000000e+00> : vector<8x128xf32>
    %3 = tpu.matmul %1, %2, %cst {dimension_numbers = #tpu.dot_dimension_numbers<[1], [0], [0], [1], [0, 0, 1, 1], [], []>} : vector<8x3072xbf16>, vector<3072x128xbf16>, vector<8x128xf32> -> vector<8x128xf32>
    %c0_3 = arith.constant 0 : index
    %c0_4 = arith.constant 0 : index
    %4 = vector.load %arg3[%c0_3, %c0_4] : memref<1x128xf32, #tpu.memory_space<vmem>>, vector<1x128xf32>
    %5 = vector.broadcast %4 : vector<1x128xf32> to vector<8x128xf32>
    %6 = arith.addf %3, %5 : vector<8x128xf32>
    %cst_5 = arith.constant 0.000000e+00 : f32
    %7 = vector.broadcast %cst_5 : f32 to vector<8x128xf32>
    %8 = arith.maximumf %6, %7 : vector<8x128xf32>
    %9 = arith.truncf %8 : vector<8x128xf32> to vector<8x128xbf16>
    %c0_6 = arith.constant 0 : index
    %c0_7 = arith.constant 0 : index
    %10 = vector.load %arg4[%c0_6, %c0_7] : memref<128x128xbf16, #tpu.memory_space<vmem>>, vector<128x128xbf16>
    %cst_8 = arith.constant dense<0.000000e+00> : vector<8x128xf32>
    %11 = tpu.matmul %9, %10, %cst_8 {dimension_numbers = #tpu.dot_dimension_numbers<[1], [0], [0], [1], [0, 0, 1, 1], [], []>} : vector<8x128xbf16>, vector<128x128xbf16>, vector<8x128xf32> -> vector<8x128xf32>
    %c0_9 = arith.constant 0 : index
    %c0_10 = arith.constant 0 : index
    %12 = vector.load %arg5[%c0_9, %c0_10] : memref<1x128xf32, #tpu.memory_space<vmem>>, vector<1x128xf32>
    %13 = vector.broadcast %12 : vector<1x128xf32> to vector<8x128xf32>
    %14 = arith.addf %11, %13 : vector<8x128xf32>
    %cst_11 = arith.constant 0.000000e+00 : f32
    %15 = vector.broadcast %cst_11 : f32 to vector<8x128xf32>
    %16 = arith.maximumf %14, %15 : vector<8x128xf32>
    %17 = arith.truncf %16 : vector<8x128xf32> to vector<8x128xbf16>
    %c0_12 = arith.constant 0 : index
    %c0_13 = arith.constant 0 : index
    %18 = vector.load %arg6[%c0_12, %c0_13] : memref<128x128xbf16, #tpu.memory_space<vmem>>, vector<128x128xbf16>
    %cst_14 = arith.constant dense<0.000000e+00> : vector<8x128xf32>
    %19 = tpu.matmul %17, %18, %cst_14 {dimension_numbers = #tpu.dot_dimension_numbers<[1], [0], [0], [1], [0, 0, 1, 1], [], []>} : vector<8x128xbf16>, vector<128x128xbf16>, vector<8x128xf32> -> vector<8x128xf32>
    %c0_15 = arith.constant 0 : index
    %c0_16 = arith.constant 0 : index
    %20 = vector.load %arg7[%c0_15, %c0_16] : memref<1x128xf32, #tpu.memory_space<vmem>>, vector<1x128xf32>
    %21 = vector.broadcast %20 : vector<1x128xf32> to vector<8x128xf32>
    %22 = arith.addf %19, %21 : vector<8x128xf32>
    %cst_17 = arith.constant 0.000000e+00 : f32
    %23 = vector.broadcast %cst_17 : f32 to vector<8x128xf32>
    %24 = arith.maximumf %22, %23 : vector<8x128xf32>
    %25 = arith.truncf %24 : vector<8x128xf32> to vector<8x128xbf16>
    %c0_18 = arith.constant 0 : index
    %c0_19 = arith.constant 0 : index
    %26 = vector.load %arg8[%c0_18, %c0_19] : memref<128x3072xbf16, #tpu.memory_space<vmem>>, vector<128x3072xbf16>
    %cst_20 = arith.constant dense<0.000000e+00> : vector<8x3072xf32>
    %27 = tpu.matmul %25, %26, %cst_20 {dimension_numbers = #tpu.dot_dimension_numbers<[1], [0], [0], [1], [0, 0, 1, 1], [], []>} : vector<8x128xbf16>, vector<128x3072xbf16>, vector<8x3072xf32> -> vector<8x3072xf32>
    %c0_21 = arith.constant 0 : index
    %c0_22 = arith.constant 0 : index
    %28 = vector.load %arg9[%c0_21, %c0_22] : memref<1x3072xf32, #tpu.memory_space<vmem>>, vector<1x3072xf32>
    %29 = vector.broadcast %28 : vector<1x3072xf32> to vector<8x3072xf32>
    %30 = arith.addf %27, %29 : vector<8x3072xf32>
    %cst_23 = arith.constant -3.000000e+01 : f32
    %cst_24 = arith.constant 3.000000e+01 : f32
    %31 = vector.broadcast %cst_23 : f32 to vector<8x3072xf32>
    %32 = arith.maximumf %31, %30 : vector<8x3072xf32>
    %33 = vector.broadcast %cst_24 : f32 to vector<8x3072xf32>
    %34 = arith.minimumf %33, %32 : vector<8x3072xf32>
    %cst_25 = arith.constant 0.000000e+00 : f32
    %35 = vector.broadcast %cst_25 : f32 to vector<8x3072xf32>
    %36 = arith.subf %35, %34 : vector<8x3072xf32>
    %37 = math.exp %36 : vector<8x3072xf32>
    %cst_26 = arith.constant 1.000000e+00 : f32
    %38 = vector.broadcast %cst_26 : f32 to vector<8x3072xf32>
    %39 = arith.addf %38, %37 : vector<8x3072xf32>
    %40 = tpu.reciprocal %39 {approx = true} : vector<8x3072xf32> -> vector<8x3072xf32>
    %41 = arith.truncf %40 : vector<8x3072xf32> to vector<8x3072xbf16>
    %c0_27 = arith.constant 0 : index
    %c0_28 = arith.constant 0 : index
    %42 = vector.load %arg10[%c0_27, %c0_28] : memref<8x3072xbf16, #tpu.memory_space<vmem>>, vector<8x3072xbf16>
    tpu.vector_store %arg10[%c0_27, %c0_28], %41 {strides = array<i32>} : memref<8x3072xbf16, #tpu.memory_space<vmem>>, vector<8x3072xbf16>,
    return
  }
  func.func @transform_0(%arg0: i32) -> (i32, i32) {
    %c0_i32 = arith.constant 0 : i32
    %c0_i32_0 = arith.constant 0 : i32
    return %arg0, %c0_i32 : i32, i32
  }
  func.func @transform_1(%arg0: i32) -> (i32, i32) {
    %c0_i32 = arith.constant 0 : i32
    %c0_i32_0 = arith.constant 0 : i32
    %c0_i32_1 = arith.constant 0 : i32
    return %c0_i32, %c0_i32_0 : i32, i32
  }
  func.func @transform_2(%arg0: i32) -> (i32, i32) {
    %c0_i32 = arith.constant 0 : i32
    %c0_i32_0 = arith.constant 0 : i32
    %c0_i32_1 = arith.constant 0 : i32
    return %c0_i32, %c0_i32_0 : i32, i32
  }
  func.func @transform_3(%arg0: i32) -> (i32, i32) {
    %c0_i32 = arith.constant 0 : i32
    %c0_i32_0 = arith.constant 0 : i32
    %c0_i32_1 = arith.constant 0 : i32
    return %c0_i32, %c0_i32_0 : i32, i32
  }
  func.func @transform_4(%arg0: i32) -> (i32, i32) {
    %c0_i32 = arith.constant 0 : i32
    %c0_i32_0 = arith.constant 0 : i32
    %c0_i32_1 = arith.constant 0 : i32
    return %c0_i32, %c0_i32_0 : i32, i32
  }
  func.func @transform_5(%arg0: i32) -> (i32, i32) {
    %c0_i32 = arith.constant 0 : i32
    %c0_i32_0 = arith.constant 0 : i32
    %c0_i32_1 = arith.constant 0 : i32
    return %c0_i32, %c0_i32_0 : i32, i32
  }
  func.func @transform_6(%arg0: i32) -> (i32, i32) {
    %c0_i32 = arith.constant 0 : i32
    %c0_i32_0 = arith.constant 0 : i32
    %c0_i32_1 = arith.constant 0 : i32
    return %c0_i32, %c0_i32_0 : i32, i32
  }
  func.func @transform_7(%arg0: i32) -> (i32, i32) {
    %c0_i32 = arith.constant 0 : i32
    %c0_i32_0 = arith.constant 0 : i32
    %c0_i32_1 = arith.constant 0 : i32
    return %c0_i32, %c0_i32_0 : i32, i32
  }
  func.func @transform_8(%arg0: i32) -> (i32, i32) {
    %c0_i32 = arith.constant 0 : i32
    %c0_i32_0 = arith.constant 0 : i32
    %c0_i32_1 = arith.constant 0 : i32
    return %c0_i32, %c0_i32_0 : i32, i32
  }
  func.func @transform_9(%arg0: i32) -> (i32, i32) {
    %c0_i32 = arith.constant 0 : i32
    %c0_i32_0 = arith.constant 0 : i32
    return %arg0, %c0_i32 : i32, i32
  }
}

</mosaic_0001>

<bundles_post_ra>
// kernel: net_forward.1
= control target key start
LH: loop header
LB: loop body
LE: loop exit
PB: predicated region body
PF: predicated region fallthrough
CT: control target
= control target key end

     0   :  { %14 = vsyncpa [#allocation3], 0  ;;  %s5917_s0 = inlined_call_operand.vmem [shape: f32[8,3072], index: 0, kind: input, shape index: {}]   ;;  %s5918_s1 = inlined_call_operand.hbm [shape: bf16[3072,128], index: 1, kind: input, shape index: {}]   ;;  %s5919_s2 = inlined_call_operand.vmem [shape: f32[1,128], index: 2, kind: input, shape index: {}]   ;;  %s5920_s3 = inlined_call_operand.vmem [shape: bf16[128,128], index: 3, kind: input, shape index: {}]   ;;  %s5921_s4 = inlined_call_operand.vmem [shape: f32[1,128], index: 4, kind: input, shape index: {}]   ;;  %s5922_s5 = inlined_call_operand.vmem [shape: bf16[128,128], index: 5, kind: input, shape index: {}]   ;;  %s5923_s6 = inlined_call_operand.vmem [shape: f32[1,128], index: 6, kind: input, shape index: {}]   ;;  %s5924_s7 = inlined_call_operand.hbm [shape: bf16[128,3072], index: 7, kind: input, shape index: {}]   ;;  %s5925_s8 = inlined_call_operand.vmem [shape: f32[1,3072], index: 8, kind: input, shape index: {}]   ;;  %s5926_s9 = inlined_call_operand.vmem [shape: bf16[8,3072], index: 9, kind: output, shape index: {}]  }
   0x1   :  { %15 = vsyncpa [#allocation5], 0  ;;  %s5546_s30 = smov [#allocation2]   ;;  %s5498_s13 = scalar_lea.hbm %s5918_s1, 24576 }
   0x2   :  { %s23_s10 = sshll.u32 %s5546_s30, 4  ;;  %p5499_p0 = scmp.ne.s32.totalorder %s5918_s1, %s5498_s13  ;;  %s24_s10 = int_to_ptr.vmem [resolvable:$true] %s23_s10 }
   0x3   :  { %p5502_p1 = scmp.lt.u32.totalorder %s5498_s13, %s5918_s1 }
   0x5   :  { %p5504_p2 = pnand %p5502_p1, %p5499_p0 }
   0x7   :  { %5507 = shalt.err (!%p5504_p2)
}
   0x8   :  { %s5508_s18 = scalar_lea.vmem %s24_s10, 24576  ;;  %p5513_p4 = scmp.lt.s32.totalorder %s24_s10, %s24_s10 }
   0x9   :  { %p5509_p3 = scmp.ne.s32.totalorder %s24_s10, %s5508_s18  ;;  %p5514_p5 = scmp.lt.s32.totalorder %s5508_s18, %s5508_s18 }
   0xb   :  { %p5515_p6 = por %p5514_p5, %p5513_p4 }
   0xd   :  { %p5516_p7 = pnand %p5515_p6, %p5509_p3 }
   0xf   :  { %5519 = shalt.err (!%p5516_p7)
}
  0x10   :  { %s5547_s19 = smov 64   ;;  %s5548_s20 = smov 4  }
  0x11   :  { %29 = dma.hbm_to_vmem [thread:$0]  %s5918_s1, 24576, %s24_s10, [#allocation3], %s5547_s19, %s5547_s19, %s5548_s20  }
  0x12   :  { %s5549_s23 = smov [#allocation4]   ;;  %s5520_s27 = scalar_lea.hbm %s5924_s7, 24576 }
  0x13   :  { %s45_s24 = sshll.u32 %s5549_s23, 4  ;;  %p5521_p8 = scmp.ne.s32.totalorder %s5924_s7, %s5520_s27  ;;  %s46_s24 = int_to_ptr.vmem [resolvable:$true] %s45_s24 }
  0x14   :  { %p5524_p9 = scmp.lt.u32.totalorder %s5520_s27, %s5924_s7 }
  0x16   :  { %p5526_p10 = pnand %p5524_p9, %p5521_p8 }
  0x18   :  { %5529 = shalt.err (!%p5526_p10)
}
  0x19   :  { %s5530_s12 = scalar_lea.vmem %s46_s24, 24576  ;;  %p5535_p12 = scmp.lt.s32.totalorder %s46_s24, %s46_s24 }
  0x1a   :  { %p5531_p11 = scmp.ne.s32.totalorder %s46_s24, %s5530_s12  ;;  %p5536_p13 = scmp.lt.s32.totalorder %s5530_s12, %s5530_s12 }
  0x1c   :  { %p5537_p0 = por %p5536_p13, %p5535_p12 }
  0x1e   :  { %p5538_p1 = pnand %p5537_p0, %p5531_p11 }
  0x20   :  { %5541 = shalt.err (!%p5538_p1)
}
  0x21   :  { %s5550_s1 = smov 1536   ;;  %s5551_s10 = smov 96  }
  0x22   :  { %51 = dma.hbm_to_vmem [thread:$0]  %s5924_s7, 24576, %s46_s24, [#allocation5], %s5550_s1, %s5550_s1, %s5551_s10  }
  0x23   :  { %5542 = dma.done.wait [#allocation3], 24576  }
  0x24   :  { %5543 = vsyncadd [#allocation3], 4294942720 }
  0x25   :  { %5544 = dma.done.wait [#allocation5], 24576  }
  0x26   :  { %5545 = vsyncadd [#allocation5], 4294942720  ;;  %v5194_v0 = vld [vmem:[#allocation2 + $0x40] sm:$0xff]   ;;  %v5198_v4 = vld [vmem:[#allocation2 + $0x48] sm:$0xff]   ;;  %vm5553_vm0 = vmmov 0  }
  0x27   :  { %v5195_v1 = vld [vmem:[#allocation2 + $0xc0] sm:$0xff]   ;;  %4863 = vmatprep.subr.bf16.mxu0 %v5194_v0  ;;  %v5199_v5 = vld [vmem:[#allocation2 + $0xc8] sm:$0xff]   ;;  %v5202_v8 = vld [vmem:[#allocation2 + $0x50] sm:$0xff]  }
  0x28   :  { %v5196_v2 = vld [vmem:[#allocation2] sm:$0xff]   ;;  %4885 = vmatprep.subr.bf16.mxu1 %v5195_v1  ;;  %v5200_v6 = vld [vmem:[#allocation2 + $0x8] sm:$0xff]   ;;  %v5203_v9 = vld [vmem:[#allocation2 + $0xd0] sm:$0xff]  }
  0x29   :  { %v5197_v3 = vld [vmem:[#allocation2 + $0x80] sm:$0xff]   ;;  %4864 = vmatpush3.bf16.msra.mxu0 %v5196_v2  ;;  %v5201_v7 = vld [vmem:[#allocation2 + $0x88] sm:$0xff]   ;;  %v5204_v10 = vld [vmem:[#allocation2 + $0x10] sm:$0xff]  }
  0x2a   :  { %4886 = vmatpush3.bf16.msra.mxu1 %v5197_v3  ;;  %4865 = vmatprep.subr.bf16.mxu0 %v5198_v4  ;;  %v5205_v11 = vld [vmem:[#allocation2 + $0x90] sm:$0xff]   ;;  %v5206_v12 = vld [vmem:[#allocation2 + $0x58] sm:$0xff]   ;;  %v5210_v16 = vld [vmem:[#allocation2 + $0x60] sm:$0xff]  }
  0x2b   :  { %4887 = vmatprep.subr.bf16.mxu1 %v5199_v5  ;;  %v5207_v13 = vld [vmem:[#allocation2 + $0xd8] sm:$0xff]   ;;  %v5211_v17 = vld [vmem:[#allocation2 + $0xe0] sm:$0xff]   ;;  %v5214_v20 = vld [vmem:[#allocation2 + $0x68] sm:$0xff]  }
  0x2c   :  { %v5208_v14 = vld [vmem:[#allocation2 + $0x18] sm:$0xff]   ;;  %v5212_v18 = vld [vmem:[#allocation2 + $0x20] sm:$0xff]   ;;  %v5215_v21 = vld [vmem:[#allocation2 + $0xe8] sm:$0xff]  }
  0x2d   :  { %4866 = vmatpush3.bf16.msra.mxu0 %v5200_v6  ;;  %v5209_v15 = vld [vmem:[#allocation2 + $0x98] sm:$0xff]   ;;  %v5213_v19 = vld [vmem:[#allocation2 + $0xa0] sm:$0xff]   ;;  %v5216_v22 = vld [vmem:[#allocation2 + $0x28] sm:$0xff]  }
  0x2e   :  { %4888 = vmatpush3.bf16.msra.mxu1 %v5201_v7  ;;  %4867 = vmatprep.subr.bf16.mxu0 %v5202_v8  ;;  %v5217_v23 = vld [vmem:[#allocation2 + $0xa8] sm:$0xff]   ;;  %v5218_v24 = vld [vmem:[#allocation2 + $0x70] sm:$0xff]   ;;  %v5222_v28 = vld [vmem:[#allocation2 + $0x78] sm:$0xff]  }
  0x2f   :  { %4889 = vmatprep.subr.bf16.mxu1 %v5203_v9  ;;  %v5219_v25 = vld [vmem:[#allocation2 + $0xf0] sm:$0xff]   ;;  %v5223_v29 = vld [vmem:[#allocation2 + $0xf8] sm:$0xff]   ;;  %v62_v32 = vld [vmem:[%s5917_s0 + $0x8] sm:$0xff] }
  0x30   :  { %v5220_v26 = vld [vmem:[#allocation2 + $0x30] sm:$0xff]   ;;  %v5224_v30 = vld [vmem:[#allocation2 + $0x38] sm:$0xff]   ;;  %v61_v34 = vld [vmem:[%s5917_s0] sm:$0xff]  ;;  %v86_v35 = vpack.c.bf16 %v62_v32, %v62_v32 }
  0x31   :  { %4868 = vmatpush3.bf16.msra.mxu0 %v5204_v10  ;;  %v5221_v27 = vld [vmem:[#allocation2 + $0xb0] sm:$0xff]   ;;  %v5225_v31 = vld [vmem:[#allocation2 + $0xb8] sm:$0xff]   ;;  %v85_v37 = vpack.c.bf16 %v61_v34, %v61_v34  ;;  %v5226_v40 = vld [vmem:[#allocation2 + $0x140] sm:$0xff]  }
  0x32   :  { %4890 = vmatpush3.bf16.msra.mxu1 %v5205_v11  ;;  %4869 = vmatprep.subr.bf16.mxu0 %v5206_v12  ;;  %v64_v33 = vld [vmem:[%s5917_s0 + $0x18] sm:$0xff]  ;;  %v63_v38 = vld [vmem:[%s5917_s0 + $0x10] sm:$0xff]  ;;  %v5227_v41 = vld [vmem:[#allocation2 + $0x1c0] sm:$0xff]  }
  0x33   :  { %4891 = vmatprep.subr.bf16.mxu1 %v5207_v13  ;;  %v88_v36 = vpack.c.bf16 %v64_v33, %v64_v33  ;;  %v87_v39 = vpack.c.bf16 %v63_v38, %v63_v38  ;;  %1684 = vmatprep.mubr.bf16.mxu0 %v86_v35  ;;  %v5228_v42 = vld [vmem:[#allocation2 + $0x100] sm:$0xff]   ;;  %v5230_v44 = vld [vmem:[#allocation2 + $0x148] sm:$0xff]   ;;  %v5234_v48 = vld [vmem:[#allocation2 + $0x150] sm:$0xff]  }
  0x34   :  { %v5229_v43 = vld [vmem:[#allocation2 + $0x180] sm:$0xff]   ;;  %v5231_v45 = vld [vmem:[#allocation2 + $0x1c8] sm:$0xff]   ;;  %v5235_v49 = vld [vmem:[#allocation2 + $0x1d0] sm:$0xff]  }
  0x35   :  { %4870 = vmatpush3.bf16.msra.mxu0 %v5208_v14  ;;  %1724 = vmatprep.mubr.bf16.mxu1 %v88_v36  ;;  %v5232_v46 = vld [vmem:[#allocation2 + $0x108] sm:$0xff]   ;;  %v5236_v50 = vld [vmem:[#allocation2 + $0x110] sm:$0xff]   ;;  %v5238_v52 = vld [vmem:[#allocation2 + $0x158] sm:$0xff]  }
  0x36   :  { %4892 = vmatpush3.bf16.msra.mxu1 %v5209_v15  ;;  %4871 = vmatprep.subr.bf16.mxu0 %v5210_v16  ;;  %v5233_v47 = vld [vmem:[#allocation2 + $0x188] sm:$0xff]   ;;  %v5237_v51 = vld [vmem:[#allocation2 + $0x190] sm:$0xff]   ;;  %v5239_v53 = vld [vmem:[#allocation2 + $0x1d8] sm:$0xff]  }
  0x37   :  { %4893 = vmatprep.subr.bf16.mxu1 %v5211_v17  ;;  %v5240_v54 = vld [vmem:[#allocation2 + $0x118] sm:$0xff]   ;;  %v5242_v56 = vld [vmem:[#allocation2 + $0x160] sm:$0xff]   ;;  %v5246_v60 = vld [vmem:[#allocation2 + $0x168] sm:$0xff]  }
  0x38   :  { %v5241_v55 = vld [vmem:[#allocation2 + $0x198] sm:$0xff]   ;;  %v5243_v57 = vld [vmem:[#allocation2 + $0x1e0] sm:$0xff]   ;;  %v5247_v61 = vld [vmem:[#allocation2 + $0x1e8] sm:$0xff]  }
  0x39   :  { %4872 = vmatpush3.bf16.msra.mxu0 %v5212_v18  ;;  %v5244_v58 = vld [vmem:[#allocation2 + $0x120] sm:$0xff]   ;;  %v5248_v62 = vld [vmem:[#allocation2 + $0x128] sm:$0xff]   ;;  %v5250_v0 = vld [vmem:[#allocation2 + $0x170] sm:$0xff]  }
  0x3a   :  { %4894 = vmatpush3.bf16.msra.mxu1 %v5213_v19  ;;  %4873 = vmatprep.subr.bf16.mxu0 %v5214_v20  ;;  %v5245_v59 = vld [vmem:[#allocation2 + $0x1a0] sm:$0xff]   ;;  %v5249_v63 = vld [vmem:[#allocation2 + $0x1a8] sm:$0xff]   ;;  %v5251_v1 = vld [vmem:[#allocation2 + $0x1f0] sm:$0xff]  }
  0x3b   :  { %4895 = vmatprep.subr.bf16.mxu1 %v5215_v21  ;;  %v5252_v2 = vld [vmem:[#allocation2 + $0x130] sm:$0xff]   ;;  %v5254_v4 = vld [vmem:[#allocation2 + $0x178] sm:$0xff]   ;;  %v66_v8 = vld [vmem:[%s5917_s0 + $0x28] sm:$0xff] }
  0x3c   :  { %v5253_v3 = vld [vmem:[#allocation2 + $0x1b0] sm:$0xff]   ;;  %v5255_v5 = vld [vmem:[#allocation2 + $0x1f8] sm:$0xff]   ;;  %v90_v10 = vpack.c.bf16 %v66_v8, %v66_v8  ;;  %v65_v12 = vld [vmem:[%s5917_s0 + $0x20] sm:$0xff] }
  0x3d   :  { %4874 = vmatpush3.bf16.msra.mxu0 %v5216_v22  ;;  %v5256_v6 = vld [vmem:[#allocation2 + $0x138] sm:$0xff]   ;;  %v67_v13 = vld [vmem:[%s5917_s0 + $0x30] sm:$0xff]  ;;  %v89_v14 = vpack.c.bf16 %v65_v12, %v65_v12  ;;  %v5258_v16 = vld [vmem:[#allocation2 + $0x240] sm:$0xff]  }
  0x3e   :  { %4896 = vmatpush3.bf16.msra.mxu1 %v5217_v23  ;;  %4875 = vmatprep.subr.bf16.mxu0 %v5218_v24  ;;  %v5257_v7 = vld [vmem:[#allocation2 + $0x1b8] sm:$0xff]   ;;  %v91_v15 = vpack.c.bf16 %v67_v13, %v67_v13  ;;  %v5259_v17 = vld [vmem:[#allocation2 + $0x2c0] sm:$0xff]   ;;  %v5262_v20 = vld [vmem:[#allocation2 + $0x248] sm:$0xff]  }
  0x3f   :  { %4897 = vmatprep.subr.bf16.mxu1 %v5219_v25  ;;  %v68_v9 = vld [vmem:[%s5917_s0 + $0x38] sm:$0xff]  ;;  %v5260_v18 = vld [vmem:[#allocation2 + $0x200] sm:$0xff]   ;;  %v5263_v21 = vld [vmem:[#allocation2 + $0x2c8] sm:$0xff]  }
  0x40   :  { %v92_v11 = vpack.c.bf16 %v68_v9, %v68_v9  ;;  %v5261_v19 = vld [vmem:[#allocation2 + $0x280] sm:$0xff]   ;;  %v5264_v22 = vld [vmem:[#allocation2 + $0x208] sm:$0xff]   ;;  %v5266_v24 = vld [vmem:[#allocation2 + $0x250] sm:$0xff]  }
  0x41   :  { %4876 = vmatpush3.bf16.msra.mxu0 %v5220_v26  ;;  %v5265_v23 = vld [vmem:[#allocation2 + $0x288] sm:$0xff]   ;;  %v5267_v25 = vld [vmem:[#allocation2 + $0x2d0] sm:$0xff]   ;;  %v5274_v32 = vld [vmem:[#allocation2 + $0x260] sm:$0xff]  }
  0x42   :  { %4898 = vmatpush3.bf16.msra.mxu1 %v5221_v27  ;;  %4877 = vmatprep.subr.bf16.mxu0 %v5222_v28  ;;  %v5268_v26 = vld [vmem:[#allocation2 + $0x210] sm:$0xff]   ;;  %v5270_v28 = vld [vmem:[#allocation2 + $0x258] sm:$0xff]   ;;  %v5275_v33 = vld [vmem:[#allocation2 + $0x2e0] sm:$0xff]  }
  0x43   :  { %4899 = vmatprep.subr.bf16.mxu1 %v5223_v29  ;;  %v5269_v27 = vld [vmem:[#allocation2 + $0x290] sm:$0xff]   ;;  %v5271_v29 = vld [vmem:[#allocation2 + $0x2d8] sm:$0xff]   ;;  %v5276_v34 = vld [vmem:[#allocation2 + $0x220] sm:$0xff]  }
  0x44   :  { %v5277_v35 = vld [vmem:[#allocation2 + $0x2a0] sm:$0xff]   ;;  %v5278_v36 = vld [vmem:[#allocation2 + $0x268] sm:$0xff]  }
  0x45   :  { %4878 = vmatpush3.bf16.msra.mxu0 %v5224_v30  ;;  %v5272_v30 = vld [vmem:[#allocation2 + $0x218] sm:$0xff]   ;;  %v5280_v38 = vld [vmem:[#allocation2 + $0x228] sm:$0xff]   ;;  %v5306_v8 = vld [vmem:[#allocation2 + $0x360] sm:$0xff]  }
  0x46   :  { %4900 = vmatpush3.bf16.msra.mxu1 %v5225_v31  ;;  %4907 = vmatprep.subr.bf16.mxu0 %v5226_v40  ;;  %v5273_v31 = vld [vmem:[#allocation2 + $0x298] sm:$0xff]   ;;  %v5282_v40 = vld [vmem:[#allocation2 + $0x270] sm:$0xff]   ;;  %v5307_v9 = vld [vmem:[#allocation2 + $0x3e0] sm:$0xff]  }
  0x47   :  { %4929 = vmatprep.subr.bf16.mxu1 %v5227_v41  ;;  %v5283_v41 = vld [vmem:[#allocation2 + $0x2f0] sm:$0xff]   ;;  %v5310_v12 = vld [vmem:[#allocation2 + $0x368] sm:$0xff]  }
  0x48   :  { %1685 = vmatmul.mubr.bf16.vlgmr.msra.gmra.mrb[0].mxu0 %v85_v37  ;;  %v5279_v37 = vld [vmem:[#allocation2 + $0x2e8] sm:$0xff]  }
  0x49   :  { %1725 = vmatmul.mubr.bf16.vlgmr.msra.gmra.mrb[0].mxu1 %v87_v39  ;;  %4908 = vmatpush3.bf16.msra.mxu0 %v5228_v42  ;;  %v5281_v39 = vld [vmem:[#allocation2 + $0x2a8] sm:$0xff]   ;;  %v5284_v42 = vld [vmem:[#allocation2 + $0x230] sm:$0xff]  }
  0x4a   :  { %4930 = vmatpush3.bf16.msra.mxu1 %v5229_v43  ;;  %4909 = vmatprep.subr.bf16.mxu0 %v5230_v44  ;;  %v5285_v43 = vld [vmem:[#allocation2 + $0x2b0] sm:$0xff]   ;;  %v5286_v44 = vld [vmem:[#allocation2 + $0x278] sm:$0xff]   ;;  %v5311_v13 = vld [vmem:[#allocation2 + $0x3e8] sm:$0xff]  }
  0x4b   :  { %4931 = vmatprep.subr.bf16.mxu1 %v5231_v45  ;;  %1764 = vmatprep.mubr.bf16.mxu0 %v90_v10  ;;  %v5287_v45 = vld [vmem:[#allocation2 + $0x2f8] sm:$0xff]   ;;  %v5308_v10 = vld [vmem:[#allocation2 + $0x320] sm:$0xff]  }
  0x4c   :  { %1804 = vmatprep.mubr.bf16.mxu1 %v92_v11  ;;  %v5309_v11 = vld [vmem:[#allocation2 + $0x3a0] sm:$0xff]  }
  0x4d   :  { %4910 = vmatpush3.bf16.msra.mxu0 %v5232_v46  ;;  %v5288_v46 = vld [vmem:[#allocation2 + $0x238] sm:$0xff]  }
  0x4e   :  { %4932 = vmatpush3.bf16.msra.mxu1 %v5233_v47  ;;  %4911 = vmatprep.subr.bf16.mxu0 %v5234_v48  ;;  %v5289_v47 = vld [vmem:[#allocation2 + $0x2b8] sm:$0xff]   ;;  %v70_v48 = vld [vmem:[%s5917_s0 + $0x48] sm:$0xff] }
  0x4f   :  { %4933 = vmatprep.subr.bf16.mxu1 %v5235_v49  ;;  %v94_v49 = vpack.c.bf16 %v70_v48, %v70_v48  ;;  %v5338_v48 = vld [vmem:[#allocation2 + $0x460] sm:$0xff]  }
  0x51   :  { %4912 = vmatpush3.bf16.msra.mxu0 %v5236_v50  ;;  %v72_v50 = vld [vmem:[%s5917_s0 + $0x58] sm:$0xff] }
  0x52   :  { %4934 = vmatpush3.bf16.msra.mxu1 %v5237_v51  ;;  %4913 = vmatprep.subr.bf16.mxu0 %v5238_v52  ;;  %v69_v51 = vld [vmem:[%s5917_s0 + $0x40] sm:$0xff]  ;;  %v71_v52 = vld [vmem:[%s5917_s0 + $0x50] sm:$0xff] }
  0x53   :  { %4935 = vmatprep.subr.bf16.mxu1 %v5239_v53  ;;  %v96_v53 = vpack.c.bf16 %v72_v50, %v72_v50  ;;  %v5340_v50 = vld [vmem:[#allocation2 + $0x420] sm:$0xff]  }
  0x55   :  { %4914 = vmatpush3.bf16.msra.mxu0 %v5240_v54  ;;  %v93_v54 = vpack.c.bf16 %v69_v51, %v69_v51  ;;  %v5341_v51 = vld [vmem:[#allocation2 + $0x4a0] sm:$0xff]  }
  0x56   :  { %4936 = vmatpush3.bf16.msra.mxu1 %v5241_v55  ;;  %4915 = vmatprep.subr.bf16.mxu0 %v5242_v56  ;;  %v95_v55 = vpack.c.bf16 %v71_v52, %v71_v52  ;;  %v5290_v56 = vld [vmem:[#allocation2 + $0x340] sm:$0xff]   ;;  %v5342_v52 = vld [vmem:[#allocation2 + $0x468] sm:$0xff]  }
  0x57   :  { %4937 = vmatprep.subr.bf16.mxu1 %v5243_v57  ;;  %v5291_v57 = vld [vmem:[#allocation2 + $0x3c0] sm:$0xff]  }
  0x59   :  { %4916 = vmatpush3.bf16.msra.mxu0 %v5244_v58  ;;  %v5292_v58 = vld [vmem:[#allocation2 + $0x300] sm:$0xff]  }
  0x5a   :  { %4938 = vmatpush3.bf16.msra.mxu1 %v5245_v59  ;;  %4917 = vmatprep.subr.bf16.mxu0 %v5246_v60  ;;  %v5293_v59 = vld [vmem:[#allocation2 + $0x380] sm:$0xff]   ;;  %v5294_v60 = vld [vmem:[#allocation2 + $0x348] sm:$0xff]  }
  0x5b   :  { %4939 = vmatprep.subr.bf16.mxu1 %v5247_v61  ;;  %v5295_v61 = vld [vmem:[#allocation2 + $0x3c8] sm:$0xff]  }
  0x5d   :  { %4918 = vmatpush3.bf16.msra.mxu0 %v5248_v62  ;;  %v5296_v62 = vld [vmem:[#allocation2 + $0x308] sm:$0xff]  }
  0x5e   :  { %4940 = vmatpush3.bf16.msra.mxu1 %v5249_v63  ;;  %4919 = vmatprep.subr.bf16.mxu0 %v5250_v0  ;;  %v5297_v63 = vld [vmem:[#allocation2 + $0x388] sm:$0xff]   ;;  %v5298_v0 = vld [vmem:[#allocation2 + $0x350] sm:$0xff]  }
  0x5f   :  { %4941 = vmatprep.subr.bf16.mxu1 %v5251_v1  ;;  %v5299_v1 = vld [vmem:[#allocation2 + $0x3d0] sm:$0xff]  }
  0x61   :  { %4920 = vmatpush3.bf16.msra.mxu0 %v5252_v2  ;;  %v5300_v2 = vld [vmem:[#allocation2 + $0x310] sm:$0xff]  }
  0x62   :  { %4942 = vmatpush3.bf16.msra.mxu1 %v5253_v3  ;;  %4921 = vmatprep.subr.bf16.mxu0 %v5254_v4  ;;  %v5301_v3 = vld [vmem:[#allocation2 + $0x390] sm:$0xff]   ;;  %v5302_v4 = vld [vmem:[#allocation2 + $0x358] sm:$0xff]  }
  0x63   :  { %4943 = vmatprep.subr.bf16.mxu1 %v5255_v5  ;;  %v5303_v5 = vld [vmem:[#allocation2 + $0x3d8] sm:$0xff]  }
  0x65   :  { %4922 = vmatpush3.bf16.msra.mxu0 %v5256_v6  ;;  %v5304_v6 = vld [vmem:[#allocation2 + $0x318] sm:$0xff]  }
  0x66   :  { %4944 = vmatpush3.bf16.msra.mxu1 %v5257_v7  ;;  %4951 = vmatprep.subr.bf16.mxu0 %v5258_v16  ;;  %v5305_v7 = vld [vmem:[#allocation2 + $0x398] sm:$0xff]   ;;  %v5314_v16 = vld [vmem:[#allocation2 + $0x370] sm:$0xff]  }
  0x67   :  { %4973 = vmatprep.subr.bf16.mxu1 %v5259_v17  ;;  %v5315_v17 = vld [vmem:[#allocation2 + $0x3f0] sm:$0xff]  }
  0x68   :  { %1765 = vmatmul.mubr.bf16.vlgmr.msra.gmra.mrb[4].mxu0 %v89_v14  ;;  %v5312_v14 = vld [vmem:[#allocation2 + $0x328] sm:$0xff]  }
  0x69   :  { %1805 = vmatmul.mubr.bf16.vlgmr.msra.gmra.mrb[4].mxu1 %v91_v15  ;;  %4952 = vmatpush3.bf16.msra.mxu0 %v5260_v18  ;;  %v5313_v15 = vld [vmem:[#allocation2 + $0x3a8] sm:$0xff]   ;;  %v5316_v18 = vld [vmem:[#allocation2 + $0x330] sm:$0xff]  }
  0x6a   :  { %4974 = vmatpush3.bf16.msra.mxu1 %v5261_v19  ;;  %4953 = vmatprep.subr.bf16.mxu0 %v5262_v20  ;;  %v5317_v19 = vld [vmem:[#allocation2 + $0x3b0] sm:$0xff]   ;;  %v5318_v20 = vld [vmem:[#allocation2 + $0x378] sm:$0xff]  }
  0x6b   :  { %4975 = vmatprep.subr.bf16.mxu1 %v5263_v21  ;;  %1844 = vmatprep.mubr.bf16.mxu0 %v94_v49  ;;  %v5319_v21 = vld [vmem:[#allocation2 + $0x3f8] sm:$0xff]   ;;  %v5339_v49 = vld [vmem:[#allocation2 + $0x4e0] sm:$0xff]  }
  0x6c   :  { %1884 = vmatprep.mubr.bf16.mxu1 %v96_v53  ;;  %v5343_v53 = vld [vmem:[#allocation2 + $0x4e8] sm:$0xff]  }
  0x6d   :  { %4954 = vmatpush3.bf16.msra.mxu0 %v5264_v22  ;;  %v5320_v22 = vld [vmem:[#allocation2 + $0x338] sm:$0xff]  }
  0x6e   :  { %4976 = vmatpush3.bf16.msra.mxu1 %v5265_v23  ;;  %4955 = vmatprep.subr.bf16.mxu0 %v5266_v24  ;;  %v5321_v23 = vld [vmem:[#allocation2 + $0x3b8] sm:$0xff]   ;;  %v74_v24 = vld [vmem:[%s5917_s0 + $0x68] sm:$0xff] }
  0x6f   :  { %4977 = vmatprep.subr.bf16.mxu1 %v5267_v25  ;;  %v76_v25 = vld [vmem:[%s5917_s0 + $0x78] sm:$0xff] }
  0x71   :  { %4956 = vmatpush3.bf16.msra.mxu0 %v5268_v26  ;;  %v73_v26 = vld [vmem:[%s5917_s0 + $0x60] sm:$0xff] }
  0x72   :  { %4978 = vmatpush3.bf16.msra.mxu1 %v5269_v27  ;;  %4957 = vmatprep.subr.bf16.mxu0 %v5270_v28  ;;  %v98_v27 = vpack.c.bf16 %v74_v24, %v74_v24  ;;  %v100_v28 = vpack.c.bf16 %v76_v25, %v76_v25  ;;  %v5370_v24 = vld [vmem:[#allocation2 + $0x560] sm:$0xff]  }
  0x73   :  { %4979 = vmatprep.subr.bf16.mxu1 %v5271_v29  ;;  %v97_v29 = vpack.c.bf16 %v73_v26, %v73_v26  ;;  %v5371_v25 = vld [vmem:[#allocation2 + $0x5e0] sm:$0xff]  }
  0x74   :  { %v5372_v26 = vld [vmem:[#allocation2 + $0x520] sm:$0xff]  }
  0x75   :  { %4958 = vmatpush3.bf16.msra.mxu0 %v5272_v30  ;;  %v75_v30 = vld [vmem:[%s5917_s0 + $0x70] sm:$0xff] }
  0x76   :  { %4980 = vmatpush3.bf16.msra.mxu1 %v5273_v31  ;;  %4959 = vmatprep.subr.bf16.mxu0 %v5274_v32  ;;  %v99_v31 = vpack.c.bf16 %v75_v30, %v75_v30  ;;  %v5322_v32 = vld [vmem:[#allocation2 + $0x440] sm:$0xff]   ;;  %v5376_v30 = vld [vmem:[#allocation2 + $0x528] sm:$0xff]  }
  0x77   :  { %4981 = vmatprep.subr.bf16.mxu1 %v5275_v33  ;;  %v5323_v33 = vld [vmem:[#allocation2 + $0x4c0] sm:$0xff]  }
  0x79   :  { %4960 = vmatpush3.bf16.msra.mxu0 %v5276_v34  ;;  %v5324_v34 = vld [vmem:[#allocation2 + $0x400] sm:$0xff]  }
  0x7a   :  { %4982 = vmatpush3.bf16.msra.mxu1 %v5277_v35  ;;  %4961 = vmatprep.subr.bf16.mxu0 %v5278_v36  ;;  %v5325_v35 = vld [vmem:[#allocation2 + $0x480] sm:$0xff]   ;;  %v5326_v36 = vld [vmem:[#allocation2 + $0x448] sm:$0xff]  }
  0x7b   :  { %4983 = vmatprep.subr.bf16.mxu1 %v5279_v37  ;;  %v5327_v37 = vld [vmem:[#allocation2 + $0x4c8] sm:$0xff]  }
  0x7d   :  { %4962 = vmatpush3.bf16.msra.mxu0 %v5280_v38  ;;  %v5328_v38 = vld [vmem:[#allocation2 + $0x408] sm:$0xff]  }
  0x7e   :  { %4984 = vmatpush3.bf16.msra.mxu1 %v5281_v39  ;;  %4963 = vmatprep.subr.bf16.mxu0 %v5282_v40  ;;  %v5329_v39 = vld [vmem:[#allocation2 + $0x488] sm:$0xff]   ;;  %v5330_v40 = vld [vmem:[#allocation2 + $0x450] sm:$0xff]  }
  0x7f   :  { %4985 = vmatprep.subr.bf16.mxu1 %v5283_v41  ;;  %v5331_v41 = vld [vmem:[#allocation2 + $0x4d0] sm:$0xff]  }
  0x81   :  { %4964 = vmatpush3.bf16.msra.mxu0 %v5284_v42  ;;  %v5332_v42 = vld [vmem:[#allocation2 + $0x410] sm:$0xff]  }
  0x82   :  { %4986 = vmatpush3.bf16.msra.mxu1 %v5285_v43  ;;  %4965 = vmatprep.subr.bf16.mxu0 %v5286_v44  ;;  %v5333_v43 = vld [vmem:[#allocation2 + $0x490] sm:$0xff]   ;;  %v5334_v44 = vld [vmem:[#allocation2 + $0x458] sm:$0xff]  }
  0x83   :  { %4987 = vmatprep.subr.bf16.mxu1 %v5287_v45  ;;  %v5335_v45 = vld [vmem:[#allocation2 + $0x4d8] sm:$0xff]  }
  0x85   :  { %4966 = vmatpush3.bf16.msra.mxu0 %v5288_v46  ;;  %v5336_v46 = vld [vmem:[#allocation2 + $0x418] sm:$0xff]  }
  0x86   :  { %4988 = vmatpush3.bf16.msra.mxu1 %v5289_v47  ;;  %4995 = vmatprep.subr.bf16.mxu0 %v5290_v56  ;;  %v5337_v47 = vld [vmem:[#allocation2 + $0x498] sm:$0xff]   ;;  %v5346_v56 = vld [vmem:[#allocation2 + $0x470] sm:$0xff]  }
  0x87   :  { %5017 = vmatprep.subr.bf16.mxu1 %v5291_v57  ;;  %v5347_v57 = vld [vmem:[#allocation2 + $0x4f0] sm:$0xff]  }
  0x88   :  { %1845 = vmatmul.mubr.bf16.vlgmr.msra.gmra.mrb[8].mxu0 %v93_v54  ;;  %v5344_v54 = vld [vmem:[#allocation2 + $0x428] sm:$0xff]  }
  0x89   :  { %1885 = vmatmul.mubr.bf16.vlgmr.msra.gmra.mrb[8].mxu1 %v95_v55  ;;  %4996 = vmatpush3.bf16.msra.mxu0 %v5292_v58  ;;  %v5345_v55 = vld [vmem:[#allocation2 + $0x4a8] sm:$0xff]   ;;  %v5348_v58 = vld [vmem:[#allocation2 + $0x430] sm:$0xff]  }
  0x8a   :  { %5018 = vmatpush3.bf16.msra.mxu1 %v5293_v59  ;;  %4997 = vmatprep.subr.bf16.mxu0 %v5294_v60  ;;  %v5349_v59 = vld [vmem:[#allocation2 + $0x4b0] sm:$0xff]   ;;  %v5350_v60 = vld [vmem:[#allocation2 + $0x478] sm:$0xff]  }
  0x8b   :  { %5019 = vmatprep.subr.bf16.mxu1 %v5295_v61  ;;  %1924 = vmatprep.mubr.bf16.mxu0 %v98_v27  ;;  %v5351_v61 = vld [vmem:[#allocation2 + $0x4f8] sm:$0xff]   ;;  %v5373_v27 = vld [vmem:[#allocation2 + $0x5a0] sm:$0xff]  }
  0x8c   :  { %1964 = vmatprep.mubr.bf16.mxu1 %v100_v28  ;;  %v5374_v28 = vld [vmem:[#allocation2 + $0x568] sm:$0xff]  }
  0x8d   :  { %4998 = vmatpush3.bf16.msra.mxu0 %v5296_v62  ;;  %v5352_v62 = vld [vmem:[#allocation2 + $0x438] sm:$0xff]  }
  0x8e   :  { %5020 = vmatpush3.bf16.msra.mxu1 %v5297_v63  ;;  %4999 = vmatprep.subr.bf16.mxu0 %v5298_v0  ;;  %v5353_v63 = vld [vmem:[#allocation2 + $0x4b8] sm:$0xff]   ;;  %v78_v0 = vld [vmem:[%s5917_s0 + $0x88] sm:$0xff] }
  0x8f   :  { %5021 = vmatprep.subr.bf16.mxu1 %v5299_v1  ;;  %v80_v1 = vld [vmem:[%s5917_s0 + $0x98] sm:$0xff] }
  0x91   :  { %5000 = vmatpush3.bf16.msra.mxu0 %v5300_v2  ;;  %v102_v2 = vpack.c.bf16 %v78_v0, %v78_v0  ;;  %v5388_v0 = vld [vmem:[%s5920_s3 + $0x10] sm:$0xff]  }
  0x92   :  { %5022 = vmatpush3.bf16.msra.mxu1 %v5301_v3  ;;  %5001 = vmatprep.subr.bf16.mxu0 %v5302_v4  ;;  %v104_v3 = vpack.c.bf16 %v80_v1, %v80_v1  ;;  %v77_v4 = vld [vmem:[%s5917_s0 + $0x80] sm:$0xff]  ;;  %v5389_v1 = vld [vmem:[%s5920_s3 + $0x18] sm:$0xff]  }
  0x93   :  { %5023 = vmatprep.subr.bf16.mxu1 %v5303_v5  ;;  %v79_v5 = vld [vmem:[%s5917_s0 + $0x90] sm:$0xff] }
  0x95   :  { %5002 = vmatpush3.bf16.msra.mxu0 %v5304_v6  ;;  %v101_v6 = vpack.c.bf16 %v77_v4, %v77_v4 }
  0x96   :  { %5024 = vmatpush3.bf16.msra.mxu1 %v5305_v7  ;;  %5003 = vmatprep.subr.bf16.mxu0 %v5306_v8  ;;  %v103_v7 = vpack.c.bf16 %v79_v5, %v79_v5  ;;  %v5354_v8 = vld [vmem:[#allocation2 + $0x540] sm:$0xff]  }
  0x97   :  { %5025 = vmatprep.subr.bf16.mxu1 %v5307_v9  ;;  %v5355_v9 = vld [vmem:[#allocation2 + $0x5c0] sm:$0xff]  }
  0x99   :  { %5004 = vmatpush3.bf16.msra.mxu0 %v5308_v10  ;;  %v5356_v10 = vld [vmem:[#allocation2 + $0x500] sm:$0xff]  }
  0x9a   :  { %5026 = vmatpush3.bf16.msra.mxu1 %v5309_v11  ;;  %5005 = vmatprep.subr.bf16.mxu0 %v5310_v12  ;;  %v5357_v11 = vld [vmem:[#allocation2 + $0x580] sm:$0xff]   ;;  %v5358_v12 = vld [vmem:[#allocation2 + $0x548] sm:$0xff]  }
  0x9b   :  { %5027 = vmatprep.subr.bf16.mxu1 %v5311_v13  ;;  %v5359_v13 = vld [vmem:[#allocation2 + $0x5c8] sm:$0xff]  }
  0x9d   :  { %5006 = vmatpush3.bf16.msra.mxu0 %v5312_v14  ;;  %v5360_v14 = vld [vmem:[#allocation2 + $0x508] sm:$0xff]  }
  0x9e   :  { %5028 = vmatpush3.bf16.msra.mxu1 %v5313_v15  ;;  %5007 = vmatprep.subr.bf16.mxu0 %v5314_v16  ;;  %v5361_v15 = vld [vmem:[#allocation2 + $0x588] sm:$0xff]   ;;  %v5362_v16 = vld [vmem:[#allocation2 + $0x550] sm:$0xff]  }
  0x9f   :  { %5029 = vmatprep.subr.bf16.mxu1 %v5315_v17  ;;  %v5363_v17 = vld [vmem:[#allocation2 + $0x5d0] sm:$0xff]  }
  0xa1   :  { %5008 = vmatpush3.bf16.msra.mxu0 %v5316_v18  ;;  %v5364_v18 = vld [vmem:[#allocation2 + $0x510] sm:$0xff]  }
  0xa2   :  { %5030 = vmatpush3.bf16.msra.mxu1 %v5317_v19  ;;  %5009 = vmatprep.subr.bf16.mxu0 %v5318_v20  ;;  %v5365_v19 = vld [vmem:[#allocation2 + $0x590] sm:$0xff]   ;;  %v5366_v20 = vld [vmem:[#allocation2 + $0x558] sm:$0xff]  }
  0xa3   :  { %5031 = vmatprep.subr.bf16.mxu1 %v5319_v21  ;;  %v5367_v21 = vld [vmem:[#allocation2 + $0x5d8] sm:$0xff]  }
  0xa5   :  { %5010 = vmatpush3.bf16.msra.mxu0 %v5320_v22  ;;  %v5368_v22 = vld [vmem:[#allocation2 + $0x518] sm:$0xff]  }
  0xa6   :  { %5032 = vmatpush3.bf16.msra.mxu1 %v5321_v23  ;;  %5039 = vmatprep.subr.bf16.mxu0 %v5322_v32  ;;  %v5369_v23 = vld [vmem:[#allocation2 + $0x598] sm:$0xff]   ;;  %v5378_v32 = vld [vmem:[#allocation2 + $0x570] sm:$0xff]  }
  0xa7   :  { %5061 = vmatprep.subr.bf16.mxu1 %v5323_v33  ;;  %v5379_v33 = vld [vmem:[#allocation2 + $0x5f0] sm:$0xff]  }
  0xa8   :  { %1925 = vmatmul.mubr.bf16.vlgmr.msra.gmra.mrb[12].mxu0 %v97_v29  ;;  %v5375_v29 = vld [vmem:[#allocation2 + $0x5e8] sm:$0xff]  }
  0xa9   :  { %1965 = vmatmul.mubr.bf16.vlgmr.msra.gmra.mrb[12].mxu1 %v99_v31  ;;  %5040 = vmatpush3.bf16.msra.mxu0 %v5324_v34  ;;  %v5377_v31 = vld [vmem:[#allocation2 + $0x5a8] sm:$0xff]   ;;  %v5380_v34 = vld [vmem:[#allocation2 + $0x530] sm:$0xff]  }
  0xaa   :  { %5062 = vmatpush3.bf16.msra.mxu1 %v5325_v35  ;;  %5041 = vmatprep.subr.bf16.mxu0 %v5326_v36  ;;  %v5381_v35 = vld [vmem:[#allocation2 + $0x5b0] sm:$0xff]   ;;  %v5382_v36 = vld [vmem:[#allocation2 + $0x578] sm:$0xff]  }
  0xab   :  { %5063 = vmatprep.subr.bf16.mxu1 %v5327_v37  ;;  %2004 = vmatprep.mubr.bf16.mxu0 %v102_v2  ;;  %v5383_v37 = vld [vmem:[#allocation2 + $0x5f8] sm:$0xff]   ;;  %v5390_v2 = vld [vmem:[%s5920_s3 + $0x20] sm:$0xff]  }
  0xac   :  { %2044 = vmatprep.mubr.bf16.mxu1 %v104_v3 }
  0xad   :  { %5042 = vmatpush3.bf16.msra.mxu0 %v5328_v38  ;;  %v5384_v38 = vld [vmem:[#allocation2 + $0x538] sm:$0xff]  }
  0xae   :  { %5064 = vmatpush3.bf16.msra.mxu1 %v5329_v39  ;;  %5043 = vmatprep.subr.bf16.mxu0 %v5330_v40  ;;  %v5385_v39 = vld [vmem:[#allocation2 + $0x5b8] sm:$0xff]   ;;  %v82_v40 = vld [vmem:[%s5917_s0 + $0xa8] sm:$0xff] }
  0xaf   :  { %5065 = vmatprep.subr.bf16.mxu1 %v5331_v41  ;;  %v106_v41 = vpack.c.bf16 %v82_v40, %v82_v40 }
  0xb1   :  { %5044 = vmatpush3.bf16.msra.mxu0 %v5332_v42  ;;  %v84_v42 = vld [vmem:[%s5917_s0 + $0xb8] sm:$0xff] }
  0xb2   :  { %5066 = vmatpush3.bf16.msra.mxu1 %v5333_v43  ;;  %5045 = vmatprep.subr.bf16.mxu0 %v5334_v44  ;;  %v81_v43 = vld [vmem:[%s5917_s0 + $0xa0] sm:$0xff]  ;;  %v83_v44 = vld [vmem:[%s5917_s0 + $0xb0] sm:$0xff] }
  0xb3   :  { %5067 = vmatprep.subr.bf16.mxu1 %v5335_v45  ;;  %v108_v45 = vpack.c.bf16 %v84_v42, %v84_v42 }
  0xb5   :  { %5046 = vmatpush3.bf16.msra.mxu0 %v5336_v46  ;;  %v105_v46 = vpack.c.bf16 %v81_v43, %v81_v43 }
  0xb6   :  { %5068 = vmatpush3.bf16.msra.mxu1 %v5337_v47  ;;  %5047 = vmatprep.subr.bf16.mxu0 %v5338_v48  ;;  %v107_v47 = vpack.c.bf16 %v83_v44, %v83_v44 }
  0xb7   :  { %5069 = vmatprep.subr.bf16.mxu1 %v5339_v49 }
  0xb9   :  { %5048 = vmatpush3.bf16.msra.mxu0 %v5340_v50  ;;  %v4412_v50 = vld [vmem:[%s5919_s2] ss:$0 sm:$0xff] }
  0xba   :  { %5070 = vmatpush3.bf16.msra.mxu1 %v5341_v51  ;;  %5049 = vmatprep.subr.bf16.mxu0 %v5342_v52 }
  0xbb   :  { %5071 = vmatprep.subr.bf16.mxu1 %v5343_v53 }
  0xbd   :  { %5050 = vmatpush3.bf16.msra.mxu0 %v5344_v54 }
  0xbe   :  { %5072 = vmatpush3.bf16.msra.mxu1 %v5345_v55  ;;  %5051 = vmatprep.subr.bf16.mxu0 %v5346_v56 }
  0xbf   :  { %5073 = vmatprep.subr.bf16.mxu1 %v5347_v57 }
  0xc1   :  { %5052 = vmatpush3.bf16.msra.mxu0 %v5348_v58 }
  0xc2   :  { %5074 = vmatpush3.bf16.msra.mxu1 %v5349_v59  ;;  %5053 = vmatprep.subr.bf16.mxu0 %v5350_v60 }
  0xc3   :  { %5075 = vmatprep.subr.bf16.mxu1 %v5351_v61  ;;  %v5386_v61 = vld [vmem:[%s5920_s3] sm:$0xff]  }
  0xc5   :  { %5054 = vmatpush3.bf16.msra.mxu0 %v5352_v62  ;;  %v5552_v62 = vmov 0.0  }
  0xc6   :  { %5076 = vmatpush3.bf16.msra.mxu1 %v5353_v63  ;;  %5083 = vmatprep.subr.bf16.mxu0 %v5354_v8  ;;  %v5387_v63 = vld [vmem:[%s5920_s3 + $0x8] sm:$0xff]  }
  0xc7   :  { %5105 = vmatprep.subr.bf16.mxu1 %v5355_v9 }
  0xc8   :  { %2005 = vmatmul.mubr.bf16.vlgmr.msra.gmra.mrb[16].mxu0 %v101_v6 }
  0xc9   :  { %2045 = vmatmul.mubr.bf16.vlgmr.msra.gmra.mrb[16].mxu1 %v103_v7  ;;  %5084 = vmatpush3.bf16.msra.mxu0 %v5356_v10 }
  0xca   :  { %5106 = vmatpush3.bf16.msra.mxu1 %v5357_v11  ;;  %5085 = vmatprep.subr.bf16.mxu0 %v5358_v12 }
  0xcb   :  { %5107 = vmatprep.subr.bf16.mxu1 %v5359_v13  ;;  %2084 = vmatprep.mubr.bf16.mxu0 %v106_v41 }
  0xcc   :  { %2124 = vmatprep.mubr.bf16.mxu1 %v108_v45 }
  0xcd   :  { %5086 = vmatpush3.bf16.msra.mxu0 %v5360_v14  ;;  %v5391_v14 = vld [vmem:[%s5920_s3 + $0x28] sm:$0xff]  }
  0xce   :  { %5108 = vmatpush3.bf16.msra.mxu1 %v5361_v15  ;;  %5087 = vmatprep.subr.bf16.mxu0 %v5362_v16  ;;  %v5392_v16 = vld [vmem:[%s5920_s3 + $0x30] sm:$0xff]  }
  0xcf   :  { %5109 = vmatprep.subr.bf16.mxu1 %v5363_v17  ;;  %v5393_v17 = vld [vmem:[%s5920_s3 + $0x38] sm:$0xff]  }
  0xd1   :  { %5088 = vmatpush3.bf16.msra.mxu0 %v5364_v18  ;;  %v5394_v18 = vld [vmem:[%s5922_s5] sm:$0xff]  }
  0xd2   :  { %5110 = vmatpush3.bf16.msra.mxu1 %v5365_v19  ;;  %5089 = vmatprep.subr.bf16.mxu0 %v5366_v20  ;;  %v5395_v19 = vld [vmem:[%s5922_s5 + $0x8] sm:$0xff]   ;;  %v5396_v20 = vld [vmem:[%s5922_s5 + $0x10] sm:$0xff]  }
  0xd3   :  { %5111 = vmatprep.subr.bf16.mxu1 %v5367_v21  ;;  %v5397_v21 = vld [vmem:[%s5922_s5 + $0x18] sm:$0xff]  }
  0xd5   :  { %5090 = vmatpush3.bf16.msra.mxu0 %v5368_v22  ;;  %v5398_v22 = vld [vmem:[%s5922_s5 + $0x20] sm:$0xff]  }
  0xd6   :  { %5112 = vmatpush3.bf16.msra.mxu1 %v5369_v23  ;;  %5091 = vmatprep.subr.bf16.mxu0 %v5370_v24 }
  0xd7   :  { %5113 = vmatprep.subr.bf16.mxu1 %v5371_v25 }
  0xd9   :  { %5092 = vmatpush3.bf16.msra.mxu0 %v5372_v26 }
  0xda   :  { %5114 = vmatpush3.bf16.msra.mxu1 %v5373_v27  ;;  %5093 = vmatprep.subr.bf16.mxu0 %v5374_v28 }
  0xdb   :  { %5115 = vmatprep.subr.bf16.mxu1 %v5375_v29  ;;  %v5399_v29 = vld [vmem:[%s5922_s5 + $0x28] sm:$0xff]  }
  0xdd   :  { %5094 = vmatpush3.bf16.msra.mxu0 %v5376_v30 }
  0xde   :  { %5116 = vmatpush3.bf16.msra.mxu1 %v5377_v31  ;;  %5095 = vmatprep.subr.bf16.mxu0 %v5378_v32 }
  0xdf   :  { %5117 = vmatprep.subr.bf16.mxu1 %v5379_v33 }
  0xe1   :  { %5096 = vmatpush3.bf16.msra.mxu0 %v5380_v34 }
  0xe2   :  { %5118 = vmatpush3.bf16.msra.mxu1 %v5381_v35  ;;  %5097 = vmatprep.subr.bf16.mxu0 %v5382_v36 }
  0xe3   :  { %5119 = vmatprep.subr.bf16.mxu1 %v5383_v37 }
  0xe5   :  { %5098 = vmatpush3.bf16.msra.mxu0 %v5384_v38 }
  0xe6   :  { %5120 = vmatpush3.bf16.msra.mxu1 %v5385_v39  ;;  %5145 = vmatprep.subr.bf16.mxu0 %v5552_v62 }
  0xe7   :  { %5165 = vmatprep.subr.bf16.mxu1 %v5552_v62 }
  0xe8   :  { %2085 = vmatmul.mubr.bf16.vlgmr.msra.gmra.mrb[20].mxu0 %v105_v46 }
  0xe9   :  { %2125 = vmatmul.mubr.bf16.vlgmr.msra.gmra.mrb[20].mxu1 %v107_v47  ;;  %5146 = vmatpush3.bf16.msra.mxu0 %v5386_v61 }
  0xea   :  { %5147 = vmatprep.subr.bf16.mxu0 %v5552_v62  ;;  %5161 = vmatprep.mubr.msk.bf16.mxu0 %vm5553_vm0, %v5552_v62 }
  0xeb   :  { %5181 = vmatprep.mubr.msk.bf16.mxu1 %vm5553_vm0, %v5552_v62  ;;  %5166 = vmatpush3.bf16.msra.mxu1 %v5394_v18  ;;  %v2373_v18 = vld [vmem:[#allocation4 + $0x68] sm:$0xff] }
  0xec   :  { %5167 = vmatprep.subr.bf16.mxu1 %v5552_v62 }
  0xed   :  { %5148 = vmatpush3.bf16.msra.mxu0 %v5387_v63 }
  0xee   :  { %5149 = vmatprep.subr.bf16.mxu0 %v5552_v62 }
  0xef   :  { %5168 = vmatpush3.bf16.msra.mxu1 %v5395_v19  ;;  %v2384_v19 = vld [vmem:[#allocation4 + $0xc0] sm:$0xff] }
  0xf0   :  { %5169 = vmatprep.subr.bf16.mxu1 %v5552_v62 }
  0xf1   :  { %5150 = vmatpush3.bf16.msra.mxu0 %v5388_v0 }
  0xf2   :  { %5151 = vmatprep.subr.bf16.mxu0 %v5552_v62 }
  0xf3   :  { %5170 = vmatpush3.bf16.msra.mxu1 %v5396_v20  ;;  %v2396_v20 = vld [vmem:[#allocation4 + $0x120] sm:$0xff] }
  0xf4   :  { %5171 = vmatprep.subr.bf16.mxu1 %v5552_v62 }
  0xf5   :  { %5152 = vmatpush3.bf16.msra.mxu0 %v5389_v1 }
  0xf6   :  { %5153 = vmatprep.subr.bf16.mxu0 %v5552_v62 }
  0xf7   :  { %5172 = vmatpush3.bf16.msra.mxu1 %v5397_v21 }
  0xf8   :  { %5173 = vmatprep.subr.bf16.mxu1 %v5552_v62 }
  0xf9   :  { %5154 = vmatpush3.bf16.msra.mxu0 %v5390_v2 }
  0xfa   :  { %5155 = vmatprep.subr.bf16.mxu0 %v5552_v62 }
  0xfb   :  { %5174 = vmatpush3.bf16.msra.mxu1 %v5398_v22 }
  0xfc   :  { %5175 = vmatprep.subr.bf16.mxu1 %v5552_v62 }
  0xfd   :  { %5156 = vmatpush3.bf16.msra.mxu0 %v5391_v14  ;;  %v2372_v14 = vld [vmem:[#allocation4 + $0x60] sm:$0xff] }
  0xfe   :  { %5157 = vmatprep.subr.bf16.mxu0 %v5552_v62 }
  0xff   :  { %5176 = vmatpush3.bf16.msra.mxu1 %v5399_v29  ;;  %v2444_v29 = vld [vmem:[#allocation4 + $0x2a0] sm:$0xff] }
 0x100   :  { %5177 = vmatprep.subr.bf16.mxu1 %v5552_v62 }
 0x101   :  { %5158 = vmatpush3.bf16.msra.mxu0 %v5392_v16 }
 0x102   :  { %5159 = vmatprep.subr.bf16.mxu0 %v5552_v62 }
 0x105   :  { %5160 = vmatpush3.bf16.msra.mxu0 %v5393_v17 }
 0x11b   :  { %v4879_v48 = vpop.f32.mrb[0].mxu0 }
 0x11c   :  { %v4901_v49 = vpop.f32.mrb[0].mxu1  ;;  %v4880_v51 = vpop.f32.mrb[1].mxu0 }
 0x11d   :  { %v4902_v52 = vpop.f32.mrb[1].mxu1  ;;  %v4881_v53 = vadd.f32 %v4880_v51, %v4879_v48  ;;  %v4882_v55 = vpop.f32.mrb[2].mxu0 }
 0x11e   :  { %v4903_v54 = vadd.f32 %v4902_v52, %v4901_v49  ;;  %v4904_v56 = vpop.f32.mrb[2].mxu1  ;;  %v4883_v57 = vpop.f32.mrb[3].mxu0 }
 0x11f   :  { %v4905_v58 = vpop.f32.mrb[3].mxu1  ;;  %v1687_v59 = vadd.f32 %v4881_v53, %v4412_v50 }
 0x121   :  { %v1727_v60 = vadd.f32 %v4903_v54, %v1687_v59 }
 0x13b   :  { %v4923_v3 = vpop.f32.mrb[4].mxu0 }
 0x13c   :  { %v4945_v4 = vpop.f32.mrb[4].mxu1  ;;  %v4924_v5 = vpop.f32.mrb[5].mxu0 }
 0x13d   :  { %v4925_v6 = vadd.f32 %v4924_v5, %v4923_v3  ;;  %v4946_v7 = vpop.f32.mrb[5].mxu1  ;;  %v4926_v8 = vpop.f32.mrb[6].mxu0 }
 0x13e   :  { %v4947_v9 = vadd.f32 %v4946_v7, %v4945_v4  ;;  %v4948_v10 = vpop.f32.mrb[6].mxu1  ;;  %v4927_v11 = vpop.f32.mrb[7].mxu0 }
 0x13f   :  { %v1767_v12 = vadd.f32 %v4925_v6, %v1727_v60  ;;  %v4949_v13 = vpop.f32.mrb[7].mxu1  ;;  %v5400_v11 = vld [vmem:[%s5922_s5 + $0x30] sm:$0xff]  }
 0x140   :  { %5178 = vmatpush3.bf16.msra.mxu1 %v5400_v11  ;;  %v2360_v13 = vld [vmem:[#allocation4] sm:$0xff] }
 0x141   :  { %v1807_v15 = vadd.f32 %v4947_v9, %v1767_v12  ;;  %5179 = vmatprep.subr.bf16.mxu1 %v5552_v62  ;;  %v5401_v12 = vld [vmem:[%s5922_s5 + $0x38] sm:$0xff]   ;;  %v4623_v16 = vcombine.low %v2360_v13, %v2372_v14  ;;  %v4624_v17 = vcombine.high %v2360_v13, %v2372_v14  ;;  %v4647_v62 = vcombine.low %v2384_v19, %v2396_v20  ;;  %v2528_v13 = vld [vmem:[#allocation4 + $0x540] sm:$0xff] }
 0x142   :  { %v2540_v14 = vld [vmem:[#allocation4 + $0x5a0] sm:$0xff] }
 0x143   :  { %3638 = vmatprep.subr.bf16.mxu0 %v4624_v17  ;;  %v2541_v17 = vld [vmem:[#allocation4 + $0x5a8] sm:$0xff] }
 0x144   :  { %5180 = vmatpush3.bf16.msra.mxu1 %v5401_v12 }
 0x15b   :  { %v4967_v23 = vpop.f32.mrb[8].mxu0 }
 0x15c   :  { %v4989_v24 = vpop.f32.mrb[8].mxu1  ;;  %v4968_v25 = vpop.f32.mrb[9].mxu0 }
 0x15d   :  { %v4969_v26 = vadd.f32 %v4968_v25, %v4967_v23  ;;  %v4990_v27 = vpop.f32.mrb[9].mxu1  ;;  %v4970_v28 = vpop.f32.mrb[10].mxu0  ;;  %v4648_v23 = vcombine.high %v2384_v19, %v2396_v20  ;;  %v2420_v25 = vld [vmem:[#allocation4 + $0x1e0] sm:$0xff] }
 0x15e   :  { %v4991_v30 = vadd.f32 %v4990_v27, %v4989_v24  ;;  %v4992_v31 = vpop.f32.mrb[10].mxu1  ;;  %v4971_v32 = vpop.f32.mrb[11].mxu0  ;;  %v2408_v24 = vld [vmem:[#allocation4 + $0x180] sm:$0xff] }
 0x15f   :  { %v1847_v33 = vadd.f32 %v4969_v26, %v1807_v15  ;;  %v4993_v34 = vpop.f32.mrb[11].mxu1  ;;  %v2361_v15 = vld [vmem:[#allocation4 + $0x8] sm:$0xff]  ;;  %v4672_v26 = vcombine.high %v2408_v24, %v2420_v25  ;;  %v4671_v27 = vcombine.low %v2408_v24, %v2420_v25  ;;  %v2432_v28 = vld [vmem:[#allocation4 + $0x240] sm:$0xff]  ;;  %v2375_v25 = vld [vmem:[#allocation4 + $0x78] sm:$0xff] }
 0x160   :  { %v4625_v21 = vcombine.low %v2361_v15, %v2373_v18  ;;  %v4626_v22 = vcombine.high %v2361_v15, %v2373_v18  ;;  %v4695_v31 = vcombine.low %v2432_v28, %v2444_v29  ;;  %v2456_v32 = vld [vmem:[#allocation4 + $0x300] sm:$0xff]  ;;  %v2529_v15 = vld [vmem:[#allocation4 + $0x548] sm:$0xff]  ;;  %v4791_v18 = vcombine.low %v2528_v13, %v2540_v14 }
 0x161   :  { %v1887_v35 = vadd.f32 %v4991_v30, %v1847_v33  ;;  %v4696_v30 = vcombine.high %v2432_v28, %v2444_v29  ;;  %v2468_v33 = vld [vmem:[#allocation4 + $0x360] sm:$0xff]  ;;  %v4793_v19 = vcombine.low %v2529_v15, %v2541_v17  ;;  %v4794_v20 = vcombine.high %v2529_v15, %v2541_v17  ;;  %v2519_v15 = vld [vmem:[#allocation4 + $0x4f8] sm:$0xff] }
 0x162   :  { %3679 = vmatprep.subr.bf16.mxu1 %v4626_v22  ;;  %v4720_v34 = vcombine.high %v2456_v32, %v2468_v33  ;;  %v2374_v22 = vld [vmem:[#allocation4 + $0x70] sm:$0xff]  ;;  %v4614_v29 = vld [vmem:[%s5923_s6] ss:$0 sm:$0xff] }
 0x17b   :  { %v5011_v36 = vpop.f32.mrb[12].mxu0 }
 0x17c   :  { %v5033_v37 = vpop.f32.mrb[12].mxu1  ;;  %v5012_v38 = vpop.f32.mrb[13].mxu0 }
 0x17d   :  { %v5034_v39 = vpop.f32.mrb[13].mxu1  ;;  %v5013_v40 = vadd.f32 %v5012_v38, %v5011_v36  ;;  %v5014_v42 = vpop.f32.mrb[14].mxu0  ;;  %v2480_v36 = vld [vmem:[#allocation4 + $0x3c0] sm:$0xff] }
 0x17e   :  { %v5035_v41 = vadd.f32 %v5034_v39, %v5033_v37  ;;  %v5036_v43 = vpop.f32.mrb[14].mxu1  ;;  %v5015_v44 = vpop.f32.mrb[15].mxu0  ;;  %v2492_v37 = vld [vmem:[#allocation4 + $0x420] sm:$0xff] }
 0x17f   :  { %v5037_v45 = vpop.f32.mrb[15].mxu1  ;;  %v1927_v46 = vadd.f32 %v5013_v40, %v1887_v35  ;;  %v4719_v35 = vcombine.low %v2456_v32, %v2468_v33  ;;  %v4744_v38 = vcombine.high %v2480_v36, %v2492_v37  ;;  %v4743_v39 = vcombine.low %v2480_v36, %v2492_v37  ;;  %v2504_v40 = vld [vmem:[#allocation4 + $0x480] sm:$0xff]  ;;  %v2386_v33 = vld [vmem:[#allocation4 + $0xd0] sm:$0xff]  ;;  %v2387_v36 = vld [vmem:[#allocation4 + $0xd8] sm:$0xff] }
 0x180   :  { %v4605_v44 = vld [vmem:[%s5921_s4] ss:$0 sm:$0xff]  ;;  %v2399_v37 = vld [vmem:[#allocation4 + $0x138] sm:$0xff] }
 0x181   :  { %v1967_v47 = vadd.f32 %v5035_v41, %v1927_v46  ;;  %v2516_v41 = vld [vmem:[#allocation4 + $0x4e0] sm:$0xff] }
 0x182   :  { %v4768_v42 = vcombine.high %v2504_v40, %v2516_v41  ;;  %v4767_v43 = vcombine.low %v2504_v40, %v2516_v41 }
 0x19b   :  { %v5055_v48 = vpop.f32.mrb[16].mxu0 }
 0x19c   :  { %v5077_v49 = vpop.f32.mrb[16].mxu1  ;;  %v5056_v50 = vpop.f32.mrb[17].mxu0 }
 0x19d   :  { %v5057_v51 = vadd.f32 %v5056_v50, %v5055_v48  ;;  %v5078_v52 = vpop.f32.mrb[17].mxu1  ;;  %v5058_v53 = vpop.f32.mrb[18].mxu0  ;;  %v2397_v50 = vld [vmem:[#allocation4 + $0x128] sm:$0xff] }
 0x19e   :  { %v5079_v54 = vadd.f32 %v5078_v52, %v5077_v49  ;;  %v5080_v55 = vpop.f32.mrb[18].mxu1  ;;  %v5059_v56 = vpop.f32.mrb[19].mxu0  ;;  %v2385_v49 = vld [vmem:[#allocation4 + $0xc8] sm:$0xff] }
 0x19f   :  { %v2007_v57 = vadd.f32 %v5057_v51, %v1967_v47  ;;  %v5081_v58 = vpop.f32.mrb[19].mxu1  ;;  %v2409_v55 = vld [vmem:[#allocation4 + $0x188] sm:$0xff] }
 0x1a0   :  { %v2421_v56 = vld [vmem:[#allocation4 + $0x1e8] sm:$0xff] }
 0x1a1   :  { %v2047_v59 = vadd.f32 %v5079_v54, %v2007_v57  ;;  %v4650_v54 = vcombine.high %v2385_v49, %v2397_v50  ;;  %v4649_v57 = vcombine.low %v2385_v49, %v2397_v50  ;;  %v4674_v58 = vcombine.high %v2409_v55, %v2421_v56 }
 0x1bb   :  { %v5099_v60 = vpop.f32.mrb[20].mxu0 }
 0x1bc   :  { %v5121_v61 = vpop.f32.mrb[20].mxu1  ;;  %v5100_v63 = vpop.f32.mrb[21].mxu0 }
 0x1bd   :  { %v5101_v0 = vadd.f32 %v5100_v63, %v5099_v60  ;;  %v5122_v1 = vpop.f32.mrb[21].mxu1  ;;  %v5102_v2 = vpop.f32.mrb[22].mxu0  ;;  %v2445_v60 = vld [vmem:[#allocation4 + $0x2a8] sm:$0xff] }
 0x1be   :  { %v5123_v3 = vadd.f32 %v5122_v1, %v5121_v61  ;;  %v5124_v4 = vpop.f32.mrb[22].mxu1  ;;  %v5103_v5 = vpop.f32.mrb[23].mxu0  ;;  %v4673_v61 = vcombine.low %v2409_v55, %v2421_v56  ;;  %v2469_v1 = vld [vmem:[#allocation4 + $0x368] sm:$0xff] }
 0x1bf   :  { %v2087_v6 = vadd.f32 %v5101_v0, %v2047_v59  ;;  %v5125_v7 = vpop.f32.mrb[23].mxu1  ;;  %v2433_v59 = vld [vmem:[#allocation4 + $0x248] sm:$0xff] }
 0x1c0   :  { %v4698_v63 = vcombine.high %v2433_v59, %v2445_v60  ;;  %v2457_v0 = vld [vmem:[#allocation4 + $0x308] sm:$0xff]  ;;  %v4697_v2 = vcombine.low %v2433_v59, %v2445_v60  ;;  %v2458_v59 = vld [vmem:[#allocation4 + $0x310] sm:$0xff] }
 0x1c1   :  { %v2127_v8 = vadd.f32 %v5123_v3, %v2087_v6  ;;  %v4722_v3 = vcombine.high %v2457_v0, %v2469_v1  ;;  %v2481_v4 = vld [vmem:[#allocation4 + $0x3c8] sm:$0xff]  ;;  %v4721_v6 = vcombine.low %v2457_v0, %v2469_v1  ;;  %v2470_v60 = vld [vmem:[#allocation4 + $0x370] sm:$0xff] }
 0x1c2   :  { %v2493_v5 = vld [vmem:[#allocation4 + $0x428] sm:$0xff] }
 0x1c3   :  { %v2132_v9 = vmax.f32 %v2127_v8, 0.0  ;;  %v4746_v7 = vcombine.high %v2481_v4, %v2493_v5  ;;  %v2505_v8 = vld [vmem:[#allocation4 + $0x488] sm:$0xff] }
 0x1c5   :  { %v2133_v10 = vpack.c.bf16 %v2132_v9, %v2132_v9  ;;  %v2517_v9 = vld [vmem:[#allocation4 + $0x4e8] sm:$0xff] }
 0x1c6   :  { %v4770_v11 = vcombine.high %v2505_v8, %v2517_v9  ;;  %v4769_v12 = vcombine.low %v2505_v8, %v2517_v9  ;;  %v4723_v8 = vcombine.low %v2458_v59, %v2470_v60 }
 0x1c7   :  { %5162 = vmatmul.mubr.bf16.vlgmr.msra.gmra.mrb[24].mxu0 %v2133_v10  ;;  %v4745_v10 = vcombine.low %v2481_v4, %v2493_v5  ;;  %v2482_v4 = vld [vmem:[#allocation4 + $0x3d0] sm:$0xff] }
 0x1c8   :  { %3639 = vmatpush1.bf16.msra.mxu0 %v4623_v16  ;;  %v4792_v16 = vcombine.high %v2528_v13, %v2540_v14  ;;  %v2494_v5 = vld [vmem:[#allocation4 + $0x430] sm:$0xff]  ;;  %v2507_v14 = vld [vmem:[#allocation4 + $0x498] sm:$0xff] }
 0x1c9   :  { %3640 = vmatprep.subr.bf16.mxu0 %v4648_v23  ;;  %v2363_v23 = vld [vmem:[#allocation4 + $0x18] sm:$0xff]  ;;  %v2518_v13 = vld [vmem:[#allocation4 + $0x4f0] sm:$0xff] }
 0x1ca   :  { %v4630_v28 = vcombine.high %v2363_v23, %v2375_v25 }
 0x1cc   :  { %3641 = vmatpush1.bf16.msra.mxu0 %v4647_v62 }
 0x1cd   :  { %3642 = vmatprep.subr.bf16.mxu0 %v4672_v26  ;;  %v5554_v26 = vmov 0  }
 0x1ce   :  { %3670 = vmatprep.mubr.bf16.mxu0 %v5554_v26 }
 0x1d0   :  { %3643 = vmatpush1.bf16.msra.mxu0 %v4671_v27  ;;  %v4629_v27 = vcombine.low %v2363_v23, %v2375_v25  ;;  %v2543_v23 = vld [vmem:[#allocation4 + $0x5b8] sm:$0xff] }
 0x1d1   :  { %3644 = vmatprep.subr.bf16.mxu0 %v4696_v30 }
 0x1d4   :  { %3645 = vmatpush1.bf16.msra.mxu0 %v4695_v31 }
 0x1d5   :  { %3646 = vmatprep.subr.bf16.mxu0 %v4720_v34 }
 0x1d8   :  { %3647 = vmatpush1.bf16.msra.mxu0 %v4719_v35  ;;  %v2398_v35 = vld [vmem:[#allocation4 + $0x130] sm:$0xff] }
 0x1d9   :  { %3648 = vmatprep.subr.bf16.mxu0 %v4744_v38  ;;  %v4652_v41 = vcombine.high %v2386_v33, %v2398_v35 }
 0x1dc   :  { %3649 = vmatpush1.bf16.msra.mxu0 %v4743_v39 }
 0x1dd   :  { %3650 = vmatprep.subr.bf16.mxu0 %v4768_v42  ;;  %v4654_v42 = vcombine.high %v2387_v36, %v2399_v37 }
 0x1e0   :  { %3651 = vmatpush1.bf16.msra.mxu0 %v4767_v43  ;;  %v2410_v43 = vld [vmem:[#allocation4 + $0x190] sm:$0xff] }
 0x1e1   :  { %3652 = vmatprep.subr.bf16.mxu0 %v4792_v16  ;;  %v4747_v16 = vcombine.low %v2482_v4, %v2494_v5 }
 0x1e4   :  { %3653 = vmatpush1.bf16.msra.mxu0 %v4791_v18 }
 0x29a   :  { %v2239_v45 = vpop.f32.mrb[24].mxu0 }
 0x29b   :  { %v2240_v46 = vadd.f32 %v4605_v44, %v2239_v45  ;;  %v5163_v47 = vpop.f32.mrb[25].mxu0  ;;  %v2422_v44 = vld [vmem:[#allocation4 + $0x1f0] sm:$0xff]  ;;  %v2411_v45 = vld [vmem:[#allocation4 + $0x198] sm:$0xff] }
 0x29c   :  { %v2242_v48 = vpop.f32.mrb[26].mxu0  ;;  %v4651_v47 = vcombine.low %v2386_v33, %v2398_v35  ;;  %v4676_v49 = vcombine.high %v2410_v43, %v2422_v44  ;;  %v4675_v55 = vcombine.low %v2410_v43, %v2422_v44 }
 0x29d   :  { %v2245_v51 = vmax.f32 %v2240_v46, 0.0  ;;  %v5164_v52 = vpop.f32.mrb[27].mxu0  ;;  %v2423_v46 = vld [vmem:[#allocation4 + $0x1f8] sm:$0xff]  ;;  %v4653_v48 = vcombine.low %v2387_v36, %v2399_v37  ;;  %v2388_v36 = vld [vmem:[#allocation4 + $0xe0] sm:$0xff] }
 0x29e   :  { %v4678_v50 = vcombine.high %v2411_v45, %v2423_v46  ;;  %v2446_v52 = vld [vmem:[#allocation4 + $0x2b0] sm:$0xff]  ;;  %v4677_v56 = vcombine.low %v2411_v45, %v2423_v46  ;;  %v2400_v37 = vld [vmem:[#allocation4 + $0x140] sm:$0xff] }
 0x29f   :  { %v2246_v53 = vpack.c.bf16 %v2245_v51, %v2245_v51  ;;  %v2434_v51 = vld [vmem:[#allocation4 + $0x250] sm:$0xff]  ;;  %v4656_v43 = vcombine.high %v2388_v36, %v2400_v37  ;;  %v2412_v45 = vld [vmem:[#allocation4 + $0x1a0] sm:$0xff] }
 0x2a0   :  { %v4699_v0 = vcombine.low %v2434_v51, %v2446_v52  ;;  %v2424_v46 = vld [vmem:[#allocation4 + $0x200] sm:$0xff] }
 0x2a1   :  { %5182 = vmatmul.mubr.bf16.vlgmr.msra.gmra.mrb[24].mxu1 %v2246_v53  ;;  %v2435_v53 = vld [vmem:[#allocation4 + $0x258] sm:$0xff] }
 0x2a2   :  { %3680 = vmatpush1.bf16.msra.mxu1 %v4625_v21  ;;  %v2362_v21 = vld [vmem:[#allocation4 + $0x10] sm:$0xff]  ;;  %3711 = vmatprep.mubr.bf16.mxu1 %v5554_v26 }
 0x2a3   :  { %3681 = vmatprep.subr.bf16.mxu1 %v4650_v54  ;;  %v4627_v62 = vcombine.low %v2362_v21, %v2374_v22  ;;  %v4628_v24 = vcombine.high %v2362_v21, %v2374_v22  ;;  %v2447_v54 = vld [vmem:[#allocation4 + $0x2b8] sm:$0xff]  ;;  %v2542_v21 = vld [vmem:[#allocation4 + $0x5b0] sm:$0xff] }
 0x2a4   :  { %v4701_v1 = vcombine.low %v2435_v53, %v2447_v54  ;;  %v2531_v22 = vld [vmem:[#allocation4 + $0x558] sm:$0xff] }
 0x2a5   :  { %3720 = vmatprep.subr.bf16.mxu0 %v4628_v24  ;;  %v4773_v24 = vcombine.low %v2507_v14, %v2519_v15  ;;  %v4797_v33 = vcombine.low %v2531_v22, %v2543_v23 }
 0x2a6   :  { %3682 = vmatpush1.bf16.msra.mxu1 %v4649_v57  ;;  %v4700_v57 = vcombine.high %v2434_v51, %v2446_v52  ;;  %v4680_v51 = vcombine.high %v2412_v45, %v2424_v46 }
 0x2a7   :  { %3683 = vmatprep.subr.bf16.mxu1 %v4674_v58  ;;  %v4702_v58 = vcombine.high %v2435_v53, %v2447_v54  ;;  %v2436_v53 = vld [vmem:[#allocation4 + $0x260] sm:$0xff] }
 0x2a8   :  { %v2448_v54 = vld [vmem:[#allocation4 + $0x2c0] sm:$0xff] }
 0x2aa   :  { %3684 = vmatpush1.bf16.msra.mxu1 %v4673_v61  ;;  %v2459_v61 = vld [vmem:[#allocation4 + $0x318] sm:$0xff] }
 0x2ab   :  { %3685 = vmatprep.subr.bf16.mxu1 %v4698_v63  ;;  %v2471_v63 = vld [vmem:[#allocation4 + $0x378] sm:$0xff] }
 0x2ac   :  { %v4725_v9 = vcombine.low %v2459_v61, %v2471_v63 }
 0x2ae   :  { %3686 = vmatpush1.bf16.msra.mxu1 %v4697_v2  ;;  %v4724_v2 = vcombine.high %v2458_v59, %v2470_v60  ;;  %v4704_v59 = vcombine.high %v2436_v53, %v2448_v54 }
 0x2af   :  { %3687 = vmatprep.subr.bf16.mxu1 %v4722_v3  ;;  %v4726_v3 = vcombine.high %v2459_v61, %v2471_v63  ;;  %v2460_v61 = vld [vmem:[#allocation4 + $0x320] sm:$0xff] }
 0x2b0   :  { %v2472_v63 = vld [vmem:[#allocation4 + $0x380] sm:$0xff] }
 0x2b2   :  { %3688 = vmatpush1.bf16.msra.mxu1 %v4721_v6  ;;  %v2483_v6 = vld [vmem:[#allocation4 + $0x3d8] sm:$0xff] }
 0x2b3   :  { %3689 = vmatprep.subr.bf16.mxu1 %v4746_v7  ;;  %v2495_v7 = vld [vmem:[#allocation4 + $0x438] sm:$0xff] }
 0x2b4   :  { %v4749_v17 = vcombine.low %v2483_v6, %v2495_v7 }
 0x2b6   :  { %3690 = vmatpush1.bf16.msra.mxu1 %v4745_v10  ;;  %v4748_v10 = vcombine.high %v2482_v4, %v2494_v5  ;;  %v4728_v4 = vcombine.high %v2460_v61, %v2472_v63 }
 0x2b7   :  { %3691 = vmatprep.subr.bf16.mxu1 %v4770_v11  ;;  %v4750_v11 = vcombine.high %v2483_v6, %v2495_v7  ;;  %v2484_v6 = vld [vmem:[#allocation4 + $0x3e0] sm:$0xff] }
 0x2b8   :  { %v2496_v7 = vld [vmem:[#allocation4 + $0x440] sm:$0xff] }
 0x2ba   :  { %3692 = vmatpush1.bf16.msra.mxu1 %v4769_v12  ;;  %v2506_v12 = vld [vmem:[#allocation4 + $0x490] sm:$0xff] }
 0x2bb   :  { %3693 = vmatprep.subr.bf16.mxu1 %v4794_v20  ;;  %v4772_v18 = vcombine.high %v2506_v12, %v2518_v13  ;;  %v2530_v20 = vld [vmem:[#allocation4 + $0x550] sm:$0xff] }
 0x2bc   :  { %v4796_v25 = vcombine.high %v2530_v20, %v2542_v21 }
 0x2be   :  { %3694 = vmatpush1.bf16.msra.mxu1 %v4793_v19  ;;  %v4774_v19 = vcombine.high %v2507_v14, %v2519_v15  ;;  %v2508_v14 = vld [vmem:[#allocation4 + $0x4a0] sm:$0xff] }
 0x2bf   :  { %3761 = vmatprep.subr.bf16.mxu1 %v4630_v28  ;;  %v2364_v28 = vld [vmem:[#allocation4 + $0x20] sm:$0xff] }
 0x2c0   :  { %v2520_v15 = vld [vmem:[#allocation4 + $0x500] sm:$0xff] }
 0x374   :  { %v2352_v30 = vpop.f32.mrb[24].mxu1 }
 0x375   :  { %v2353_v31 = vadd.f32 %v4614_v29, %v2352_v30  ;;  %v5183_v32 = vpop.f32.mrb[25].mxu1  ;;  %v2376_v29 = vld [vmem:[#allocation4 + $0x80] sm:$0xff]  ;;  %v2365_v30 = vld [vmem:[#allocation4 + $0x28] sm:$0xff] }
 0x376   :  { %v2355_v34 = vpop.f32.mrb[26].mxu1  ;;  %v4795_v32 = vcombine.low %v2530_v20, %v2542_v21  ;;  %v4776_v20 = vcombine.high %v2508_v14, %v2520_v15 }
 0x377   :  { %v2358_v38 = vmax.f32 %v2353_v31, 0.0  ;;  %v5184_v39 = vpop.f32.mrb[27].mxu1  ;;  %v2377_v31 = vld [vmem:[#allocation4 + $0x88] sm:$0xff]  ;;  %v4632_v34 = vcombine.high %v2364_v28, %v2376_v29 }
 0x378   :  { %v4634_v35 = vcombine.high %v2365_v30, %v2377_v31  ;;  %v2401_v39 = vld [vmem:[#allocation4 + $0x148] sm:$0xff] }
 0x379   :  { %v5778_v40 = vpack.c.bf16 %v2358_v38, %v2358_v38  ;;  %v2389_v38 = vld [vmem:[#allocation4 + $0xe8] sm:$0xff] }
 0x37a   :  { %v4658_v44 = vcombine.high %v2389_v38, %v2401_v39 }
 0x37b   :  { %3671 = vmatmul.mubr.bf16.vlgmr.msra.gmra.mrb[28].mxu0 %v5778_v40  ;;  %3712 = vmatmul.mubr.bf16.vlgmr.msra.gmra.mrb[28].mxu1 %v5778_v40 }
 0x37c   :  { %3721 = vmatpush1.bf16.msra.mxu0 %v4627_v62  ;;  %3762 = vmatpush1.bf16.msra.mxu1 %v4629_v27  ;;  %v4771_v62 = vcombine.low %v2506_v12, %v2518_v13  ;;  %v4798_v27 = vcombine.high %v2531_v22, %v2543_v23  ;;  %v4752_v12 = vcombine.high %v2484_v6, %v2496_v7  ;;  %v2532_v22 = vld [vmem:[#allocation4 + $0x560] sm:$0xff] }
 0x37d   :  { %3722 = vmatprep.subr.bf16.mxu0 %v4652_v41  ;;  %3763 = vmatprep.subr.bf16.mxu1 %v4654_v42  ;;  %v4631_v41 = vcombine.low %v2364_v28, %v2376_v29  ;;  %v4633_v42 = vcombine.low %v2365_v30, %v2377_v31  ;;  %v2544_v23 = vld [vmem:[#allocation4 + $0x5c0] sm:$0xff]  ;;  %v2366_v30 = vld [vmem:[#allocation4 + $0x30] sm:$0xff] }
 0x37e   :  { %3752 = vmatprep.mubr.bf16.mxu0 %v5554_v26  ;;  %3793 = vmatprep.mubr.bf16.mxu1 %v5554_v26  ;;  %v4800_v28 = vcombine.high %v2532_v22, %v2544_v23  ;;  %v2378_v31 = vld [vmem:[#allocation4 + $0x90] sm:$0xff] }
 0x380   :  { %3723 = vmatpush1.bf16.msra.mxu0 %v4651_v47  ;;  %3764 = vmatpush1.bf16.msra.mxu1 %v4653_v48  ;;  %v2413_v47 = vld [vmem:[#allocation4 + $0x1a8] sm:$0xff] }
 0x381   :  { %3724 = vmatprep.subr.bf16.mxu0 %v4676_v49  ;;  %3765 = vmatprep.subr.bf16.mxu1 %v4678_v50  ;;  %v2425_v48 = vld [vmem:[#allocation4 + $0x208] sm:$0xff]  ;;  %v4655_v49 = vcombine.low %v2388_v36, %v2400_v37  ;;  %v4657_v50 = vcombine.low %v2389_v38, %v2401_v39  ;;  %v4636_v36 = vcombine.high %v2366_v30, %v2378_v31  ;;  %v2390_v38 = vld [vmem:[#allocation4 + $0xf0] sm:$0xff] }
 0x382   :  { %v4682_v52 = vcombine.high %v2413_v47, %v2425_v48  ;;  %v2402_v39 = vld [vmem:[#allocation4 + $0x150] sm:$0xff] }
 0x384   :  { %3725 = vmatpush1.bf16.msra.mxu0 %v4675_v55  ;;  %3766 = vmatpush1.bf16.msra.mxu1 %v4677_v56  ;;  %v2437_v55 = vld [vmem:[#allocation4 + $0x268] sm:$0xff] }
 0x385   :  { %3726 = vmatprep.subr.bf16.mxu0 %v4700_v57  ;;  %3767 = vmatprep.subr.bf16.mxu1 %v4702_v58  ;;  %v2449_v56 = vld [vmem:[#allocation4 + $0x2c8] sm:$0xff]  ;;  %v4679_v57 = vcombine.low %v2412_v45, %v2424_v46  ;;  %v4681_v58 = vcombine.low %v2413_v47, %v2425_v48  ;;  %v4660_v45 = vcombine.high %v2390_v38, %v2402_v39  ;;  %v2414_v47 = vld [vmem:[#allocation4 + $0x1b0] sm:$0xff] }
 0x386   :  { %v4706_v60 = vcombine.high %v2437_v55, %v2449_v56  ;;  %v2426_v48 = vld [vmem:[#allocation4 + $0x210] sm:$0xff] }
 0x388   :  { %3727 = vmatpush1.bf16.msra.mxu0 %v4699_v0  ;;  %3768 = vmatpush1.bf16.msra.mxu1 %v4701_v1  ;;  %v2461_v0 = vld [vmem:[#allocation4 + $0x328] sm:$0xff] }
 0x389   :  { %3728 = vmatprep.subr.bf16.mxu0 %v4724_v2  ;;  %3769 = vmatprep.subr.bf16.mxu1 %v4726_v3  ;;  %v2473_v1 = vld [vmem:[#allocation4 + $0x388] sm:$0xff]  ;;  %v4703_v2 = vcombine.low %v2436_v53, %v2448_v54  ;;  %v4705_v3 = vcombine.low %v2437_v55, %v2449_v56  ;;  %v4684_v53 = vcombine.high %v2414_v47, %v2426_v48  ;;  %v2438_v55 = vld [vmem:[#allocation4 + $0x270] sm:$0xff] }
 0x38a   :  { %v4730_v5 = vcombine.high %v2461_v0, %v2473_v1  ;;  %v2450_v56 = vld [vmem:[#allocation4 + $0x2d0] sm:$0xff] }
 0x38c   :  { %3729 = vmatpush1.bf16.msra.mxu0 %v4723_v8  ;;  %3770 = vmatpush1.bf16.msra.mxu1 %v4725_v9  ;;  %v2485_v8 = vld [vmem:[#allocation4 + $0x3e8] sm:$0xff] }
 0x38d   :  { %3730 = vmatprep.subr.bf16.mxu0 %v4748_v10  ;;  %3771 = vmatprep.subr.bf16.mxu1 %v4750_v11  ;;  %v2497_v9 = vld [vmem:[#allocation4 + $0x448] sm:$0xff]  ;;  %v4727_v10 = vcombine.low %v2460_v61, %v2472_v63  ;;  %v4729_v11 = vcombine.low %v2461_v0, %v2473_v1  ;;  %v4708_v61 = vcombine.high %v2438_v55, %v2450_v56  ;;  %v2462_v0 = vld [vmem:[#allocation4 + $0x330] sm:$0xff] }
 0x38e   :  { %v4754_v13 = vcombine.high %v2485_v8, %v2497_v9  ;;  %v2474_v1 = vld [vmem:[#allocation4 + $0x390] sm:$0xff] }
 0x390   :  { %3731 = vmatpush1.bf16.msra.mxu0 %v4747_v16  ;;  %3772 = vmatpush1.bf16.msra.mxu1 %v4749_v17  ;;  %v2509_v16 = vld [vmem:[#allocation4 + $0x4a8] sm:$0xff] }
 0x391   :  { %3732 = vmatprep.subr.bf16.mxu0 %v4772_v18  ;;  %3773 = vmatprep.subr.bf16.mxu1 %v4774_v19  ;;  %v2521_v17 = vld [vmem:[#allocation4 + $0x508] sm:$0xff]  ;;  %v4751_v18 = vcombine.low %v2484_v6, %v2496_v7  ;;  %v4753_v19 = vcombine.low %v2485_v8, %v2497_v9  ;;  %v4732_v6 = vcombine.high %v2462_v0, %v2474_v1  ;;  %v2486_v8 = vld [vmem:[#allocation4 + $0x3f0] sm:$0xff] }
 0x392   :  { %v4778_v21 = vcombine.high %v2509_v16, %v2521_v17  ;;  %v2498_v9 = vld [vmem:[#allocation4 + $0x450] sm:$0xff] }
 0x394   :  { %3733 = vmatpush1.bf16.msra.mxu0 %v4771_v62  ;;  %3774 = vmatpush1.bf16.msra.mxu1 %v4773_v24  ;;  %v2533_v62 = vld [vmem:[#allocation4 + $0x568] sm:$0xff] }
 0x395   :  { %3734 = vmatprep.subr.bf16.mxu0 %v4796_v25  ;;  %3775 = vmatprep.subr.bf16.mxu1 %v4798_v27  ;;  %v2545_v24 = vld [vmem:[#allocation4 + $0x5c8] sm:$0xff]  ;;  %v4775_v25 = vcombine.low %v2508_v14, %v2520_v15  ;;  %v4777_v27 = vcombine.low %v2509_v16, %v2521_v17  ;;  %v4756_v14 = vcombine.high %v2486_v8, %v2498_v9  ;;  %v2510_v16 = vld [vmem:[#allocation4 + $0x4b0] sm:$0xff] }
 0x396   :  { %v4802_v29 = vcombine.high %v2533_v62, %v2545_v24  ;;  %v2522_v17 = vld [vmem:[#allocation4 + $0x510] sm:$0xff] }
 0x398   :  { %3735 = vmatpush1.bf16.msra.mxu0 %v4795_v32  ;;  %3776 = vmatpush1.bf16.msra.mxu1 %v4797_v33  ;;  %v2367_v32 = vld [vmem:[#allocation4 + $0x38] sm:$0xff] }
 0x399   :  { %3802 = vmatprep.subr.bf16.mxu0 %v4632_v34  ;;  %3843 = vmatprep.subr.bf16.mxu1 %v4634_v35  ;;  %v2379_v33 = vld [vmem:[#allocation4 + $0x98] sm:$0xff]  ;;  %v4799_v34 = vcombine.low %v2532_v22, %v2544_v23  ;;  %v4801_v35 = vcombine.low %v2533_v62, %v2545_v24  ;;  %v4780_v22 = vcombine.high %v2510_v16, %v2522_v17  ;;  %v2534_v62 = vld [vmem:[#allocation4 + $0x570] sm:$0xff] }
 0x39a   :  { %v4638_v37 = vcombine.high %v2367_v32, %v2379_v33  ;;  %v2546_v24 = vld [vmem:[#allocation4 + $0x5d0] sm:$0xff] }
 0x39b   :  { %3753 = vmatmul.mubr.bf16.vlgmr.msra.gmra.mrb[32].mxu0 %v5778_v40  ;;  %3794 = vmatmul.mubr.bf16.vlgmr.msra.gmra.mrb[32].mxu1 %v5778_v40 }
 0x39c   :  { %3803 = vmatpush1.bf16.msra.mxu0 %v4631_v41  ;;  %3844 = vmatpush1.bf16.msra.mxu1 %v4633_v42  ;;  %v2391_v41 = vld [vmem:[#allocation4 + $0xf8] sm:$0xff] }
 0x39d   :  { %3804 = vmatprep.subr.bf16.mxu0 %v4656_v43  ;;  %3845 = vmatprep.subr.bf16.mxu1 %v4658_v44  ;;  %v2403_v42 = vld [vmem:[#allocation4 + $0x158] sm:$0xff]  ;;  %v4635_v43 = vcombine.low %v2366_v30, %v2378_v31  ;;  %v4637_v44 = vcombine.low %v2367_v32, %v2379_v33  ;;  %v4804_v30 = vcombine.high %v2534_v62, %v2546_v24  ;;  %v2368_v32 = vld [vmem:[#allocation4 + $0x40] sm:$0xff] }
 0x39e   :  { %3834 = vmatprep.mubr.bf16.mxu0 %v5554_v26  ;;  %3875 = vmatprep.mubr.bf16.mxu1 %v5554_v26  ;;  %v4662_v46 = vcombine.high %v2391_v41, %v2403_v42  ;;  %v2380_v33 = vld [vmem:[#allocation4 + $0xa0] sm:$0xff] }
 0x3a0   :  { %3805 = vmatpush1.bf16.msra.mxu0 %v4655_v49  ;;  %3846 = vmatpush1.bf16.msra.mxu1 %v4657_v50  ;;  %v2415_v49 = vld [vmem:[#allocation4 + $0x1b8] sm:$0xff] }
 0x3a1   :  { %3806 = vmatprep.subr.bf16.mxu0 %v4680_v51  ;;  %3847 = vmatprep.subr.bf16.mxu1 %v4682_v52  ;;  %v2427_v50 = vld [vmem:[#allocation4 + $0x218] sm:$0xff]  ;;  %v4659_v51 = vcombine.low %v2390_v38, %v2402_v39  ;;  %v4661_v52 = vcombine.low %v2391_v41, %v2403_v42  ;;  %v4640_v38 = vcombine.high %v2368_v32, %v2380_v33  ;;  %v2392_v41 = vld [vmem:[#allocation4 + $0x100] sm:$0xff] }
 0x3a2   :  { %v4686_v54 = vcombine.high %v2415_v49, %v2427_v50  ;;  %v2404_v42 = vld [vmem:[#allocation4 + $0x160] sm:$0xff] }
 0x3a4   :  { %3807 = vmatpush1.bf16.msra.mxu0 %v4679_v57  ;;  %3848 = vmatpush1.bf16.msra.mxu1 %v4681_v58  ;;  %v2439_v57 = vld [vmem:[#allocation4 + $0x278] sm:$0xff] }
 0x3a5   :  { %3808 = vmatprep.subr.bf16.mxu0 %v4704_v59  ;;  %3849 = vmatprep.subr.bf16.mxu1 %v4706_v60  ;;  %v2451_v58 = vld [vmem:[#allocation4 + $0x2d8] sm:$0xff]  ;;  %v4683_v59 = vcombine.low %v2414_v47, %v2426_v48  ;;  %v4685_v60 = vcombine.low %v2415_v49, %v2427_v50  ;;  %v4664_v47 = vcombine.high %v2392_v41, %v2404_v42  ;;  %v2416_v49 = vld [vmem:[#allocation4 + $0x1c0] sm:$0xff] }
 0x3a6   :  { %v4710_v63 = vcombine.high %v2439_v57, %v2451_v58  ;;  %v2428_v50 = vld [vmem:[#allocation4 + $0x220] sm:$0xff] }
 0x3a8   :  { %3809 = vmatpush1.bf16.msra.mxu0 %v4703_v2  ;;  %3850 = vmatpush1.bf16.msra.mxu1 %v4705_v3  ;;  %v2463_v2 = vld [vmem:[#allocation4 + $0x338] sm:$0xff] }
 0x3a9   :  { %3810 = vmatprep.subr.bf16.mxu0 %v4728_v4  ;;  %3851 = vmatprep.subr.bf16.mxu1 %v4730_v5  ;;  %v2475_v3 = vld [vmem:[#allocation4 + $0x398] sm:$0xff]  ;;  %v4707_v4 = vcombine.low %v2438_v55, %v2450_v56  ;;  %v4709_v5 = vcombine.low %v2439_v57, %v2451_v58  ;;  %v4688_v55 = vcombine.high %v2416_v49, %v2428_v50  ;;  %v2440_v57 = vld [vmem:[#allocation4 + $0x280] sm:$0xff] }
 0x3aa   :  { %v4734_v7 = vcombine.high %v2463_v2, %v2475_v3  ;;  %v2452_v58 = vld [vmem:[#allocation4 + $0x2e0] sm:$0xff] }
 0x3ac   :  { %3811 = vmatpush1.bf16.msra.mxu0 %v4727_v10  ;;  %3852 = vmatpush1.bf16.msra.mxu1 %v4729_v11  ;;  %v2487_v10 = vld [vmem:[#allocation4 + $0x3f8] sm:$0xff] }
 0x3ad   :  { %3812 = vmatprep.subr.bf16.mxu0 %v4752_v12  ;;  %3853 = vmatprep.subr.bf16.mxu1 %v4754_v13  ;;  %v2499_v11 = vld [vmem:[#allocation4 + $0x458] sm:$0xff]  ;;  %v4731_v12 = vcombine.low %v2462_v0, %v2474_v1  ;;  %v4733_v13 = vcombine.low %v2463_v2, %v2475_v3  ;;  %v4712_v0 = vcombine.high %v2440_v57, %v2452_v58  ;;  %v2464_v2 = vld [vmem:[#allocation4 + $0x340] sm:$0xff] }
 0x3ae   :  { %v4758_v15 = vcombine.high %v2487_v10, %v2499_v11  ;;  %v2476_v3 = vld [vmem:[#allocation4 + $0x3a0] sm:$0xff] }
 0x3b0   :  { %3813 = vmatpush1.bf16.msra.mxu0 %v4751_v18  ;;  %3854 = vmatpush1.bf16.msra.mxu1 %v4753_v19  ;;  %v2511_v18 = vld [vmem:[#allocation4 + $0x4b8] sm:$0xff] }
 0x3b1   :  { %3814 = vmatprep.subr.bf16.mxu0 %v4776_v20  ;;  %3855 = vmatprep.subr.bf16.mxu1 %v4778_v21  ;;  %v2523_v19 = vld [vmem:[#allocation4 + $0x518] sm:$0xff]  ;;  %v4755_v20 = vcombine.low %v2486_v8, %v2498_v9  ;;  %v4757_v21 = vcombine.low %v2487_v10, %v2499_v11  ;;  %v4736_v8 = vcombine.high %v2464_v2, %v2476_v3  ;;  %v2488_v10 = vld [vmem:[#allocation4 + $0x400] sm:$0xff] }
 0x3b2   :  { %v4782_v23 = vcombine.high %v2511_v18, %v2523_v19  ;;  %v2500_v11 = vld [vmem:[#allocation4 + $0x460] sm:$0xff] }
 0x3b4   :  { %3815 = vmatpush1.bf16.msra.mxu0 %v4775_v25  ;;  %3856 = vmatpush1.bf16.msra.mxu1 %v4777_v27  ;;  %v2535_v25 = vld [vmem:[#allocation4 + $0x578] sm:$0xff] }
 0x3b5   :  { %3816 = vmatprep.subr.bf16.mxu0 %v4800_v28  ;;  %3857 = vmatprep.subr.bf16.mxu1 %v4802_v29  ;;  %v2547_v27 = vld [vmem:[#allocation4 + $0x5d8] sm:$0xff]  ;;  %v4779_v28 = vcombine.low %v2510_v16, %v2522_v17  ;;  %v4781_v29 = vcombine.low %v2511_v18, %v2523_v19  ;;  %v4760_v16 = vcombine.high %v2488_v10, %v2500_v11  ;;  %v2512_v18 = vld [vmem:[#allocation4 + $0x4c0] sm:$0xff] }
 0x3b6   :  { %v4806_v31 = vcombine.high %v2535_v25, %v2547_v27  ;;  %v2524_v19 = vld [vmem:[#allocation4 + $0x520] sm:$0xff] }
 0x3b8   :  { %3817 = vmatpush1.bf16.msra.mxu0 %v4799_v34  ;;  %3858 = vmatpush1.bf16.msra.mxu1 %v4801_v35  ;;  %v2369_v34 = vld [vmem:[#allocation4 + $0x48] sm:$0xff] }
 0x3b9   :  { %3884 = vmatprep.subr.bf16.mxu0 %v4636_v36  ;;  %3925 = vmatprep.subr.bf16.mxu1 %v4638_v37  ;;  %v2381_v35 = vld [vmem:[#allocation4 + $0xa8] sm:$0xff]  ;;  %v4803_v36 = vcombine.low %v2534_v62, %v2546_v24  ;;  %v4805_v37 = vcombine.low %v2535_v25, %v2547_v27  ;;  %v4784_v62 = vcombine.high %v2512_v18, %v2524_v19  ;;  %v2536_v25 = vld [vmem:[#allocation4 + $0x580] sm:$0xff] }
 0x3ba   :  { %v4642_v39 = vcombine.high %v2369_v34, %v2381_v35  ;;  %v2548_v27 = vld [vmem:[#allocation4 + $0x5e0] sm:$0xff] }
 0x3bb   :  { %3835 = vmatmul.mubr.bf16.vlgmr.msra.gmra.mrb[36].mxu0 %v5778_v40  ;;  %3876 = vmatmul.mubr.bf16.vlgmr.msra.gmra.mrb[36].mxu1 %v5778_v40 }
 0x3bc   :  { %3885 = vmatpush1.bf16.msra.mxu0 %v4635_v43  ;;  %3926 = vmatpush1.bf16.msra.mxu1 %v4637_v44  ;;  %v2393_v43 = vld [vmem:[#allocation4 + $0x108] sm:$0xff] }
 0x3bd   :  { %3886 = vmatprep.subr.bf16.mxu0 %v4660_v45  ;;  %3927 = vmatprep.subr.bf16.mxu1 %v4662_v46  ;;  %v2405_v44 = vld [vmem:[#allocation4 + $0x168] sm:$0xff]  ;;  %v4639_v45 = vcombine.low %v2368_v32, %v2380_v33  ;;  %v4641_v46 = vcombine.low %v2369_v34, %v2381_v35  ;;  %v4808_v32 = vcombine.high %v2536_v25, %v2548_v27  ;;  %v2370_v34 = vld [vmem:[#allocation4 + $0x50] sm:$0xff] }
 0x3be   :  { %3916 = vmatprep.mubr.bf16.mxu0 %v5554_v26  ;;  %3957 = vmatprep.mubr.bf16.mxu1 %v5554_v26  ;;  %v4666_v48 = vcombine.high %v2393_v43, %v2405_v44  ;;  %v2382_v35 = vld [vmem:[#allocation4 + $0xb0] sm:$0xff] }
 0x3c0   :  { %3887 = vmatpush1.bf16.msra.mxu0 %v4659_v51  ;;  %3928 = vmatpush1.bf16.msra.mxu1 %v4661_v52  ;;  %v2417_v51 = vld [vmem:[#allocation4 + $0x1c8] sm:$0xff] }
 0x3c1   :  { %3888 = vmatprep.subr.bf16.mxu0 %v4684_v53  ;;  %3929 = vmatprep.subr.bf16.mxu1 %v4686_v54  ;;  %v2429_v52 = vld [vmem:[#allocation4 + $0x228] sm:$0xff]  ;;  %v4663_v53 = vcombine.low %v2392_v41, %v2404_v42  ;;  %v4665_v54 = vcombine.low %v2393_v43, %v2405_v44  ;;  %v4644_v41 = vcombine.high %v2370_v34, %v2382_v35  ;;  %v2394_v43 = vld [vmem:[#allocation4 + $0x110] sm:$0xff] }
 0x3c2   :  { %v4690_v56 = vcombine.high %v2417_v51, %v2429_v52  ;;  %v2406_v44 = vld [vmem:[#allocation4 + $0x170] sm:$0xff] }
 0x3c4   :  { %3889 = vmatpush1.bf16.msra.mxu0 %v4683_v59  ;;  %3930 = vmatpush1.bf16.msra.mxu1 %v4685_v60  ;;  %v2441_v59 = vld [vmem:[#allocation4 + $0x288] sm:$0xff] }
 0x3c5   :  { %3890 = vmatprep.subr.bf16.mxu0 %v4708_v61  ;;  %3931 = vmatprep.subr.bf16.mxu1 %v4710_v63  ;;  %v2453_v60 = vld [vmem:[#allocation4 + $0x2e8] sm:$0xff]  ;;  %v4687_v61 = vcombine.low %v2416_v49, %v2428_v50  ;;  %v4689_v63 = vcombine.low %v2417_v51, %v2429_v52  ;;  %v4668_v49 = vcombine.high %v2394_v43, %v2406_v44  ;;  %v2418_v51 = vld [vmem:[#allocation4 + $0x1d0] sm:$0xff] }
 0x3c6   :  { %v4714_v1 = vcombine.high %v2441_v59, %v2453_v60  ;;  %v2430_v52 = vld [vmem:[#allocation4 + $0x230] sm:$0xff] }
 0x3c8   :  { %3891 = vmatpush1.bf16.msra.mxu0 %v4707_v4  ;;  %3932 = vmatpush1.bf16.msra.mxu1 %v4709_v5  ;;  %v2465_v4 = vld [vmem:[#allocation4 + $0x348] sm:$0xff] }
 0x3c9   :  { %3892 = vmatprep.subr.bf16.mxu0 %v4732_v6  ;;  %3933 = vmatprep.subr.bf16.mxu1 %v4734_v7  ;;  %v2477_v5 = vld [vmem:[#allocation4 + $0x3a8] sm:$0xff]  ;;  %v4711_v6 = vcombine.low %v2440_v57, %v2452_v58  ;;  %v4713_v7 = vcombine.low %v2441_v59, %v2453_v60  ;;  %v4692_v57 = vcombine.high %v2418_v51, %v2430_v52  ;;  %v2442_v59 = vld [vmem:[#allocation4 + $0x290] sm:$0xff] }
 0x3ca   :  { %v4738_v9 = vcombine.high %v2465_v4, %v2477_v5  ;;  %v2454_v60 = vld [vmem:[#allocation4 + $0x2f0] sm:$0xff] }
 0x3cc   :  { %3893 = vmatpush1.bf16.msra.mxu0 %v4731_v12  ;;  %3934 = vmatpush1.bf16.msra.mxu1 %v4733_v13  ;;  %v2489_v12 = vld [vmem:[#allocation4 + $0x408] sm:$0xff] }
 0x3cd   :  { %3894 = vmatprep.subr.bf16.mxu0 %v4756_v14  ;;  %3935 = vmatprep.subr.bf16.mxu1 %v4758_v15  ;;  %v2501_v13 = vld [vmem:[#allocation4 + $0x468] sm:$0xff]  ;;  %v4735_v14 = vcombine.low %v2464_v2, %v2476_v3  ;;  %v4737_v15 = vcombine.low %v2465_v4, %v2477_v5  ;;  %v4716_v2 = vcombine.high %v2442_v59, %v2454_v60  ;;  %v2466_v4 = vld [vmem:[#allocation4 + $0x350] sm:$0xff] }
 0x3ce   :  { %v4762_v17 = vcombine.high %v2489_v12, %v2501_v13  ;;  %v2478_v5 = vld [vmem:[#allocation4 + $0x3b0] sm:$0xff] }
 0x3d0   :  { %3895 = vmatpush1.bf16.msra.mxu0 %v4755_v20  ;;  %3936 = vmatpush1.bf16.msra.mxu1 %v4757_v21  ;;  %v2513_v20 = vld [vmem:[#allocation4 + $0x4c8] sm:$0xff] }
 0x3d1   :  { %3896 = vmatprep.subr.bf16.mxu0 %v4780_v22  ;;  %3937 = vmatprep.subr.bf16.mxu1 %v4782_v23  ;;  %v2525_v21 = vld [vmem:[#allocation4 + $0x528] sm:$0xff]  ;;  %v4759_v22 = vcombine.low %v2488_v10, %v2500_v11  ;;  %v4761_v23 = vcombine.low %v2489_v12, %v2501_v13  ;;  %v4740_v10 = vcombine.high %v2466_v4, %v2478_v5  ;;  %v2490_v11 = vld [vmem:[#allocation4 + $0x410] sm:$0xff]  ;;  %v2491_v13 = vld [vmem:[#allocation4 + $0x418] sm:$0xff] }
 0x3d2   :  { %v4786_v24 = vcombine.high %v2513_v20, %v2525_v21  ;;  %v2502_v12 = vld [vmem:[#allocation4 + $0x470] sm:$0xff] }
 0x3d4   :  { %3897 = vmatpush1.bf16.msra.mxu0 %v4779_v28  ;;  %3938 = vmatpush1.bf16.msra.mxu1 %v4781_v29  ;;  %v2537_v28 = vld [vmem:[#allocation4 + $0x588] sm:$0xff] }
 0x3d5   :  { %3898 = vmatprep.subr.bf16.mxu0 %v4804_v30  ;;  %3939 = vmatprep.subr.bf16.mxu1 %v4806_v31  ;;  %v2549_v29 = vld [vmem:[#allocation4 + $0x5e8] sm:$0xff]  ;;  %v4783_v30 = vcombine.low %v2512_v18, %v2524_v19  ;;  %v4785_v31 = vcombine.low %v2513_v20, %v2525_v21  ;;  %v2514_v19 = vld [vmem:[#allocation4 + $0x4d0] sm:$0xff]  ;;  %v2515_v21 = vld [vmem:[#allocation4 + $0x4d8] sm:$0xff] }
 0x3d6   :  { %v4810_v33 = vcombine.high %v2537_v28, %v2549_v29  ;;  %v2526_v20 = vld [vmem:[#allocation4 + $0x530] sm:$0xff] }
 0x3d8   :  { %3899 = vmatpush1.bf16.msra.mxu0 %v4803_v36  ;;  %3940 = vmatpush1.bf16.msra.mxu1 %v4805_v37  ;;  %v2371_v36 = vld [vmem:[#allocation4 + $0x58] sm:$0xff] }
 0x3d9   :  { %3966 = vmatprep.subr.bf16.mxu0 %v4640_v38  ;;  %4007 = vmatprep.subr.bf16.mxu1 %v4642_v39  ;;  %v2383_v37 = vld [vmem:[#allocation4 + $0xb8] sm:$0xff]  ;;  %v4807_v38 = vcombine.low %v2536_v25, %v2548_v27  ;;  %v4809_v39 = vcombine.low %v2537_v28, %v2549_v29  ;;  %v2538_v27 = vld [vmem:[#allocation4 + $0x590] sm:$0xff] }
 0x3da   :  { %v4646_v42 = vcombine.high %v2371_v36, %v2383_v37  ;;  %v2550_v28 = vld [vmem:[#allocation4 + $0x5f0] sm:$0xff]  ;;  %v2539_v29 = vld [vmem:[#allocation4 + $0x598] sm:$0xff] }
 0x3db   :  { %3917 = vmatmul.mubr.bf16.vlgmr.msra.gmra.mrb[40].mxu0 %v5778_v40  ;;  %3958 = vmatmul.mubr.bf16.vlgmr.msra.gmra.mrb[40].mxu1 %v5778_v40 }
 0x3dc   :  { %3967 = vmatpush1.bf16.msra.mxu0 %v4639_v45  ;;  %4008 = vmatpush1.bf16.msra.mxu1 %v4641_v46  ;;  %v2395_v45 = vld [vmem:[#allocation4 + $0x118] sm:$0xff] }
 0x3dd   :  { %3968 = vmatprep.subr.bf16.mxu0 %v4664_v47  ;;  %4009 = vmatprep.subr.bf16.mxu1 %v4666_v48  ;;  %v2407_v46 = vld [vmem:[#allocation4 + $0x178] sm:$0xff]  ;;  %v4643_v47 = vcombine.low %v2370_v34, %v2382_v35  ;;  %v4645_v48 = vcombine.low %v2371_v36, %v2383_v37  ;;  %v4811_v35 = vcombine.low %v2538_v27, %v2550_v28  ;;  %v2558_v37 = vlaneseq }
 0x3de   :  { %3998 = vmatprep.mubr.bf16.mxu0 %v5554_v26  ;;  %4039 = vmatprep.mubr.bf16.mxu1 %v5554_v26  ;;  %v4670_v50 = vcombine.high %v2395_v45, %v2407_v46 }
 0x3e0   :  { %3969 = vmatpush1.bf16.msra.mxu0 %v4663_v53  ;;  %4010 = vmatpush1.bf16.msra.mxu1 %v4665_v54  ;;  %v2419_v53 = vld [vmem:[#allocation4 + $0x1d8] sm:$0xff] }
 0x3e1   :  { %3970 = vmatprep.subr.bf16.mxu0 %v4688_v55  ;;  %4011 = vmatprep.subr.bf16.mxu1 %v4690_v56  ;;  %v2431_v54 = vld [vmem:[#allocation4 + $0x238] sm:$0xff]  ;;  %v4667_v55 = vcombine.low %v2394_v43, %v2406_v44  ;;  %v4669_v56 = vcombine.low %v2395_v45, %v2407_v46 }
 0x3e2   :  { %v4694_v58 = vcombine.high %v2419_v53, %v2431_v54 }
 0x3e4   :  { %3971 = vmatpush1.bf16.msra.mxu0 %v4687_v61  ;;  %4012 = vmatpush1.bf16.msra.mxu1 %v4689_v63  ;;  %v2443_v61 = vld [vmem:[#allocation4 + $0x298] sm:$0xff] }
 0x3e5   :  { %3972 = vmatprep.subr.bf16.mxu0 %v4712_v0  ;;  %4013 = vmatprep.subr.bf16.mxu1 %v4714_v1  ;;  %v2455_v63 = vld [vmem:[#allocation4 + $0x2f8] sm:$0xff]  ;;  %v4691_v0 = vcombine.low %v2418_v51, %v2430_v52  ;;  %v4693_v1 = vcombine.low %v2419_v53, %v2431_v54 }
 0x3e6   :  { %v4718_v3 = vcombine.high %v2443_v61, %v2455_v63 }
 0x3e8   :  { %3973 = vmatpush1.bf16.msra.mxu0 %v4711_v6  ;;  %4014 = vmatpush1.bf16.msra.mxu1 %v4713_v7  ;;  %v2467_v6 = vld [vmem:[#allocation4 + $0x358] sm:$0xff] }
 0x3e9   :  { %3974 = vmatprep.subr.bf16.mxu0 %v4736_v8  ;;  %4015 = vmatprep.subr.bf16.mxu1 %v4738_v9  ;;  %v2479_v7 = vld [vmem:[#allocation4 + $0x3b8] sm:$0xff]  ;;  %v4715_v8 = vcombine.low %v2442_v59, %v2454_v60  ;;  %v4717_v9 = vcombine.low %v2443_v61, %v2455_v63 }
 0x3ec   :  { %3975 = vmatpush1.bf16.msra.mxu0 %v4735_v14  ;;  %4016 = vmatpush1.bf16.msra.mxu1 %v4737_v15  ;;  %v2503_v14 = vld [vmem:[#allocation4 + $0x478] sm:$0xff]  ;;  %v4739_v15 = vcombine.low %v2466_v4, %v2478_v5 }
 0x3ed   :  { %3976 = vmatprep.subr.bf16.mxu0 %v4760_v16  ;;  %4017 = vmatprep.subr.bf16.mxu1 %v4762_v17  ;;  %v4741_v16 = vcombine.low %v2467_v6, %v2479_v7  ;;  %v4764_v17 = vcombine.high %v2490_v11, %v2502_v12  ;;  %v4766_v18 = vcombine.high %v2491_v13, %v2503_v14 }
 0x3f0   :  { %3977 = vmatpush1.bf16.msra.mxu0 %v4759_v22  ;;  %4018 = vmatpush1.bf16.msra.mxu1 %v4761_v23  ;;  %v2527_v22 = vld [vmem:[#allocation4 + $0x538] sm:$0xff]  ;;  %v4763_v23 = vcombine.low %v2490_v11, %v2502_v12 }
 0x3f1   :  { %3978 = vmatprep.subr.bf16.mxu0 %v4784_v62  ;;  %4019 = vmatprep.subr.bf16.mxu1 %v4786_v24  ;;  %v4765_v62 = vcombine.low %v2491_v13, %v2503_v14  ;;  %v4788_v24 = vcombine.high %v2514_v19, %v2526_v20  ;;  %v4790_v25 = vcombine.high %v2515_v21, %v2527_v22 }
 0x3f4   :  { %3979 = vmatpush1.bf16.msra.mxu0 %v4783_v30  ;;  %4020 = vmatpush1.bf16.msra.mxu1 %v4785_v31  ;;  %v2551_v30 = vld [vmem:[#allocation4 + $0x5f8] sm:$0xff]  ;;  %v4787_v31 = vcombine.low %v2514_v19, %v2526_v20 }
 0x3f5   :  { %3980 = vmatprep.subr.bf16.mxu0 %v4808_v32  ;;  %4021 = vmatprep.subr.bf16.mxu1 %v4810_v33  ;;  %v4789_v32 = vcombine.low %v2515_v21, %v2527_v22  ;;  %v4812_v33 = vcombine.high %v2538_v27, %v2550_v28  ;;  %v4814_v34 = vcombine.high %v2539_v29, %v2551_v30 }
 0x3f6   :  { %v4813_v36 = vcombine.low %v2539_v29, %v2551_v30 }
 0x3f8   :  { %3981 = vmatpush1.bf16.msra.mxu0 %v4807_v38  ;;  %4022 = vmatpush1.bf16.msra.mxu1 %v4809_v39  ;;  %v2559_v38 = vshrl.u32 %v2558_v37, 7 }
 0x3f9   :  { %4048 = vmatprep.subr.bf16.mxu0 %v4644_v41  ;;  %4089 = vmatprep.subr.bf16.mxu1 %v4646_v42  ;;  %v5809_v42 = vld [vmem:[%s5925_s8] sm:$0xff] }
 0x3fa   :  { %v5802_v39 = vsub.s32 0, %v2559_v38  ;;  %v5804_v41 = vsub.s32 2, %v2559_v38  ;;  %v5811_v43 = vsub.s32 1, %v2559_v38  ;;  %v5813_v44 = vsub.s32 3, %v2559_v38 }
 0x3fb   :  { %3999 = vmatmul.mubr.bf16.vlgmr.msra.gmra.mrb[44].mxu0 %v5778_v40  ;;  %4040 = vmatmul.mubr.bf16.vlgmr.msra.gmra.mrb[44].mxu1 %v5778_v40  ;;  %v5829_v19 = vsub.s32 7, %v2559_v38 }
 0x3fc   :  { %4049 = vmatpush1.bf16.msra.mxu0 %v4643_v47  ;;  %4090 = vmatpush1.bf16.msra.mxu1 %v4645_v48  ;;  %v2561_v45 = vrot.slane %v5809_v42, %v5802_v39  ;;  %v2565_v46 = vrot.slane %v5809_v42, %v5811_v43  ;;  %v2573_v47 = vrot.slane %v5809_v42, %v5813_v44 }
 0x3fd   :  { %4050 = vmatprep.subr.bf16.mxu0 %v4668_v49  ;;  %4091 = vmatprep.subr.bf16.mxu1 %v4670_v50 }
 0x3fe   :  { %4080 = vmatprep.mubr.bf16.mxu0 %v5554_v26  ;;  %4121 = vmatprep.mubr.bf16.mxu1 %v5554_v26  ;;  %v4742_v26 = vcombine.high %v2467_v6, %v2479_v7 }
 0x400   :  { %4051 = vmatpush1.bf16.msra.mxu0 %v4667_v55  ;;  %4092 = vmatpush1.bf16.msra.mxu1 %v4669_v56 }
 0x401   :  { %4052 = vmatprep.subr.bf16.mxu0 %v4692_v57  ;;  %4093 = vmatprep.subr.bf16.mxu1 %v4694_v58 }
 0x404   :  { %4053 = vmatpush1.bf16.msra.mxu0 %v4691_v0  ;;  %4094 = vmatpush1.bf16.msra.mxu1 %v4693_v1 }
 0x405   :  { %4054 = vmatprep.subr.bf16.mxu0 %v4716_v2  ;;  %4095 = vmatprep.subr.bf16.mxu1 %v4718_v3 }
 0x408   :  { %4055 = vmatpush1.bf16.msra.mxu0 %v4715_v8  ;;  %4096 = vmatpush1.bf16.msra.mxu1 %v4717_v9 }
 0x409   :  { %4056 = vmatprep.subr.bf16.mxu0 %v4740_v10  ;;  %4097 = vmatprep.subr.bf16.mxu1 %v4742_v26 }
 0x40c   :  { %4057 = vmatpush1.bf16.msra.mxu0 %v4739_v15  ;;  %4098 = vmatpush1.bf16.msra.mxu1 %v4741_v16  ;;  %v5823_v16 = vsub.s32 4, %v2559_v38 }
 0x40d   :  { %4058 = vmatprep.subr.bf16.mxu0 %v4764_v17  ;;  %4099 = vmatprep.subr.bf16.mxu1 %v4766_v18  ;;  %v5825_v17 = vsub.s32 6, %v2559_v38  ;;  %v5827_v18 = vsub.s32 5, %v2559_v38 }
 0x40e   :  { %v2577_v20 = vrot.slane %v5809_v42, %v5823_v16 }
 0x40f   :  { %v2585_v21 = vrot.slane %v5809_v42, %v5825_v17  ;;  %v2581_v22 = vrot.slane %v5809_v42, %v5827_v18 }
 0x410   :  { %4059 = vmatpush1.bf16.msra.mxu0 %v4763_v23  ;;  %4100 = vmatpush1.bf16.msra.mxu1 %v4765_v62  ;;  %v2589_v23 = vrot.slane %v5809_v42, %v5829_v19 }
 0x411   :  { %4060 = vmatprep.subr.bf16.mxu0 %v4788_v24  ;;  %4101 = vmatprep.subr.bf16.mxu1 %v4790_v25 }
 0x414   :  { %4061 = vmatpush1.bf16.msra.mxu0 %v4787_v31  ;;  %4102 = vmatpush1.bf16.msra.mxu1 %v4789_v32 }
 0x415   :  { %4062 = vmatprep.subr.bf16.mxu0 %v4812_v33  ;;  %4103 = vmatprep.subr.bf16.mxu1 %v4814_v34 }
 0x418   :  { %4063 = vmatpush1.bf16.msra.mxu0 %v4811_v35  ;;  %4104 = vmatpush1.bf16.msra.mxu1 %v4813_v36 }
 0x41b   :  { %4081 = vmatmul.mubr.bf16.vlgmr.msra.gmra.mrb[48].mxu0 %v5778_v40  ;;  %4122 = vmatmul.mubr.bf16.vlgmr.msra.gmra.mrb[48].mxu1 %v5778_v40  ;;  %v2569_v40 = vrot.slane %v5809_v42, %v5804_v41 }
 0x44e   :  { %v3672_v48 = vpop.f32.mrb[28].mxu0  ;;  %v3713_v49 = vpop.f32.mrb[28].mxu1 }
 0x44f   :  { %v3673_v50 = vadd.f32 %v3672_v48, %v2561_v45  ;;  %v3714_v51 = vadd.f32 %v3713_v49, %v2569_v40  ;;  %v3674_v52 = vpop.f32.mrb[29].mxu0  ;;  %v3715_v53 = vpop.f32.mrb[29].mxu1 }
 0x450   :  { %v3675_v54 = vadd.f32 %v3674_v52, %v2565_v46  ;;  %v3716_v55 = vadd.f32 %v3715_v53, %v2573_v47  ;;  %v3676_v56 = vpop.f32.mrb[30].mxu0  ;;  %v3717_v57 = vpop.f32.mrb[30].mxu1 }
 0x451   :  { %v4815_v58 = vclamps-f32 %v3673_v50, 30.0  ;;  %v4817_v59 = vclamps-f32 %v3714_v51, 30.0  ;;  %v3677_v60 = vpop.f32.mrb[31].mxu0  ;;  %v3718_v61 = vpop.f32.mrb[31].mxu1 }
 0x452   :  { %v4816_v63 = vclamps-f32 %v3675_v54, 30.0  ;;  %v4818_v0 = vclamps-f32 %v3716_v55, 30.0 }
 0x453   :  { %v4178_v1 = vsub.f32 0.0, %v4815_v58  ;;  %v4180_v2 = vsub.f32 0.0, %v4817_v59 }
 0x454   :  { %v4179_v3 = vsub.f32 0.0, %v4816_v63  ;;  %v4181_v4 = vsub.f32 0.0, %v4818_v0 }
 0x455   :  { %v4202_v5 = vmul.f32 1.442695, %v4178_v1  ;;  %v4206_v6 = vmul.f32 1.442695, %v4180_v2 }
 0x456   :  { %v4204_v7 = vmul.f32 1.442695, %v4179_v3  ;;  %v4208_v8 = vmul.f32 1.442695, %v4181_v4  ;;  %v5848_v3 = vld [vmem:[%s5925_s8 + $0x8] sm:$0xff] }
 0x457   :  { %5402 = vpow2.f32 %v4202_v5  ;;  %v2593_v4 = vrot.slane %v5848_v3, %v5802_v39  ;;  %v2601_v5 = vrot.slane %v5848_v3, %v5804_v41 }
 0x458   :  { %5404 = vpow2.f32 %v4206_v6  ;;  %v2597_v6 = vrot.slane %v5848_v3, %v5811_v43 }
 0x459   :  { %5406 = vpow2.f32 %v4204_v7  ;;  %v2605_v7 = vrot.slane %v5848_v3, %v5813_v44 }
 0x45a   :  { %5408 = vpow2.f32 %v4208_v8 }
 0x461   :  { %v5403_v9 = vpop.eup %5402 }
 0x462   :  { %v5405_v10 = vpop.eup %5404  ;;  %v4250_v26 = vadd.f32 1.0, %v5403_v9 }
 0x463   :  { %v5407_v11 = vpop.eup %5406  ;;  %v4252_v12 = vadd.f32 1.0, %v5405_v10 }
 0x464   :  { %v5409_v13 = vpop.eup %5408  ;;  %5410 = vrcp.f32 %v4250_v26  ;;  %v4251_v14 = vadd.f32 1.0, %v5407_v11 }
 0x465   :  { %5412 = vrcp.f32 %v4252_v12  ;;  %v4253_v15 = vadd.f32 1.0, %v5409_v13 }
 0x466   :  { %5414 = vrcp.f32 %v4251_v14 }
 0x467   :  { %5416 = vrcp.f32 %v4253_v15 }
 0x46e   :  { %v5411_v62 = vpop.eup %5410  ;;  %v3754_v24 = vpop.f32.mrb[32].mxu0 }
 0x46f   :  { %v3795_v25 = vpop.f32.mrb[32].mxu1  ;;  %v5413_v27 = vpop.eup %5412  ;;  %v3755_v28 = vadd.f32 %v3754_v24, %v2577_v20 }
 0x470   :  { %v3796_v29 = vadd.f32 %v3795_v25, %v2585_v21  ;;  %v3756_v30 = vpop.f32.mrb[33].mxu0  ;;  %v3797_v31 = vpop.f32.mrb[33].mxu1 }
 0x471   :  { %v5415_v32 = vpop.eup %5414  ;;  %v3757_v33 = vadd.f32 %v3756_v30, %v2581_v22  ;;  %v3798_v34 = vadd.f32 %v3797_v31, %v2589_v23  ;;  %v3758_v35 = vpop.f32.mrb[34].mxu0  ;;  %v4819_v45 = vclamps-f32 %v3755_v28, 30.0 }
 0x472   :  { %v3799_v36 = vpop.f32.mrb[34].mxu1  ;;  %v5417_v37 = vpop.eup %5416  ;;  %v4851_v38 = vpack.c.bf16 %v5415_v32, %v5411_v62  ;;  %v4821_v40 = vclamps-f32 %v3796_v29, 30.0 }
 0x473   :  { %v3759_v46 = vpop.f32.mrb[35].mxu0  ;;  %v3800_v47 = vpop.f32.mrb[35].mxu1  ;;  %v4852_v42 = vpack.c.bf16 %v5417_v37, %v5413_v27  ;;  %v4820_v48 = vclamps-f32 %v3757_v33, 30.0  ;;  %v4822_v49 = vclamps-f32 %v3798_v34, 30.0  ;;  %v4182_v50 = vsub.f32 0.0, %v4819_v45 }
 0x474   :  { %4394 = vst [vmem:[%s5926_s9] sm:$0xff] %v4851_v38  ;;  %v4184_v51 = vsub.f32 0.0, %v4821_v40 }
 0x475   :  { %4395 = vst [vmem:[%s5926_s9 + $0x8] sm:$0xff] %v4852_v42  ;;  %v4183_v52 = vsub.f32 0.0, %v4820_v48  ;;  %v4185_v53 = vsub.f32 0.0, %v4822_v49  ;;  %v4210_v54 = vmul.f32 1.442695, %v4182_v50 }
 0x476   :  { %v4214_v55 = vmul.f32 1.442695, %v4184_v51 }
 0x477   :  { %v4212_v56 = vmul.f32 1.442695, %v4183_v52  ;;  %v4216_v57 = vmul.f32 1.442695, %v4185_v53  ;;  %5418 = vpow2.f32 %v4210_v54  ;;  %v2609_v53 = vrot.slane %v5848_v3, %v5823_v16 }
 0x478   :  { %5420 = vpow2.f32 %v4214_v55  ;;  %v2617_v54 = vrot.slane %v5848_v3, %v5825_v17  ;;  %v2613_v55 = vrot.slane %v5848_v3, %v5827_v18 }
 0x479   :  { %5422 = vpow2.f32 %v4212_v56  ;;  %v2621_v56 = vrot.slane %v5848_v3, %v5829_v19 }
 0x47a   :  { %5424 = vpow2.f32 %v4216_v57 }
 0x481   :  { %v5419_v58 = vpop.eup %5418 }
 0x482   :  { %v5421_v59 = vpop.eup %5420  ;;  %v4254_v60 = vadd.f32 1.0, %v5419_v58 }
 0x483   :  { %v5423_v61 = vpop.eup %5422  ;;  %v4256_v63 = vadd.f32 1.0, %v5421_v59 }
 0x484   :  { %v5425_v0 = vpop.eup %5424  ;;  %5426 = vrcp.f32 %v4254_v60  ;;  %v4255_v1 = vadd.f32 1.0, %v5423_v61 }
 0x485   :  { %5428 = vrcp.f32 %v4256_v63  ;;  %v4257_v2 = vadd.f32 1.0, %v5425_v0 }
 0x486   :  { %5430 = vrcp.f32 %v4255_v1 }
 0x487   :  { %5432 = vrcp.f32 %v4257_v2 }
 0x48e   :  { %v5427_v8 = vpop.eup %5426  ;;  %v3836_v9 = vpop.f32.mrb[36].mxu0 }
 0x48f   :  { %v3877_v10 = vpop.f32.mrb[36].mxu1  ;;  %v5429_v26 = vpop.eup %5428  ;;  %v3837_v11 = vadd.f32 %v3836_v9, %v2593_v4 }
 0x490   :  { %v3878_v12 = vadd.f32 %v3877_v10, %v2601_v5  ;;  %v3838_v13 = vpop.f32.mrb[37].mxu0  ;;  %v3879_v14 = vpop.f32.mrb[37].mxu1 }
 0x491   :  { %v5431_v15 = vpop.eup %5430  ;;  %v3839_v20 = vadd.f32 %v3838_v13, %v2597_v6  ;;  %v3880_v21 = vadd.f32 %v3879_v14, %v2605_v7  ;;  %v3840_v22 = vpop.f32.mrb[38].mxu0  ;;  %v4823_v25 = vclamps-f32 %v3837_v11, 30.0 }
 0x492   :  { %v3881_v23 = vpop.f32.mrb[38].mxu1  ;;  %v5433_v62 = vpop.eup %5432  ;;  %v4853_v24 = vpack.c.bf16 %v5431_v15, %v5427_v8  ;;  %v4825_v27 = vclamps-f32 %v3878_v12, 30.0 }
 0x493   :  { %v3841_v28 = vpop.f32.mrb[39].mxu0  ;;  %v3882_v29 = vpop.f32.mrb[39].mxu1  ;;  %v4854_v30 = vpack.c.bf16 %v5433_v62, %v5429_v26  ;;  %v4824_v31 = vclamps-f32 %v3839_v20, 30.0  ;;  %v4826_v32 = vclamps-f32 %v3880_v21, 30.0  ;;  %v4186_v33 = vsub.f32 0.0, %v4823_v25 }
 0x494   :  { %4396 = vst [vmem:[%s5926_s9 + $0x10] sm:$0xff] %v4853_v24  ;;  %v4188_v34 = vsub.f32 0.0, %v4825_v27 }
 0x495   :  { %4397 = vst [vmem:[%s5926_s9 + $0x18] sm:$0xff] %v4854_v30  ;;  %v4187_v35 = vsub.f32 0.0, %v4824_v31  ;;  %v4189_v36 = vsub.f32 0.0, %v4826_v32  ;;  %v4218_v37 = vmul.f32 1.442695, %v4186_v33 }
 0x496   :  { %v4222_v38 = vmul.f32 1.442695, %v4188_v34 }
 0x497   :  { %v4220_v45 = vmul.f32 1.442695, %v4187_v35  ;;  %v4224_v40 = vmul.f32 1.442695, %v4189_v36  ;;  %5434 = vpow2.f32 %v4218_v37  ;;  %v5881_v35 = vld [vmem:[%s5925_s8 + $0x10] sm:$0xff] }
 0x498   :  { %5436 = vpow2.f32 %v4222_v38  ;;  %v2625_v36 = vrot.slane %v5881_v35, %v5802_v39  ;;  %v2633_v37 = vrot.slane %v5881_v35, %v5804_v41  ;;  %v2629_v38 = vrot.slane %v5881_v35, %v5811_v43 }
 0x499   :  { %5438 = vpow2.f32 %v4220_v45  ;;  %v2637_v45 = vrot.slane %v5881_v35, %v5813_v44 }
 0x49a   :  { %5440 = vpow2.f32 %v4224_v40 }
 0x4a1   :  { %v5435_v46 = vpop.eup %5434 }
 0x4a2   :  { %v5437_v47 = vpop.eup %5436  ;;  %v4258_v42 = vadd.f32 1.0, %v5435_v46 }
 0x4a3   :  { %v5439_v48 = vpop.eup %5438  ;;  %v4260_v49 = vadd.f32 1.0, %v5437_v47 }
 0x4a4   :  { %v5441_v50 = vpop.eup %5440  ;;  %5442 = vrcp.f32 %v4258_v42  ;;  %v4259_v51 = vadd.f32 1.0, %v5439_v48 }
 0x4a5   :  { %5444 = vrcp.f32 %v4260_v49  ;;  %v4261_v52 = vadd.f32 1.0, %v5441_v50 }
 0x4a6   :  { %5446 = vrcp.f32 %v4259_v51 }
 0x4a7   :  { %5448 = vrcp.f32 %v4261_v52 }
 0x4ae   :  { %v5443_v57 = vpop.eup %5442  ;;  %v3918_v58 = vpop.f32.mrb[40].mxu0 }
 0x4af   :  { %v3959_v59 = vpop.f32.mrb[40].mxu1  ;;  %v5445_v60 = vpop.eup %5444  ;;  %v3919_v61 = vadd.f32 %v3918_v58, %v2609_v53 }
 0x4b0   :  { %v3960_v63 = vadd.f32 %v3959_v59, %v2617_v54  ;;  %v3920_v0 = vpop.f32.mrb[41].mxu0  ;;  %v3961_v1 = vpop.f32.mrb[41].mxu1 }
 0x4b1   :  { %v5447_v2 = vpop.eup %5446  ;;  %v3921_v4 = vadd.f32 %v3920_v0, %v2613_v55  ;;  %v3962_v5 = vadd.f32 %v3961_v1, %v2621_v56  ;;  %v3922_v6 = vpop.f32.mrb[42].mxu0  ;;  %v4827_v10 = vclamps-f32 %v3919_v61, 30.0 }
 0x4b2   :  { %v3963_v7 = vpop.f32.mrb[42].mxu1  ;;  %v5449_v8 = vpop.eup %5448  ;;  %v4855_v9 = vpack.c.bf16 %v5447_v2, %v5443_v57  ;;  %v4829_v26 = vclamps-f32 %v3960_v63, 30.0 }
 0x4b3   :  { %v3923_v11 = vpop.f32.mrb[43].mxu0  ;;  %v3964_v12 = vpop.f32.mrb[43].mxu1  ;;  %v4856_v3 = vpack.c.bf16 %v5449_v8, %v5445_v60  ;;  %v4828_v13 = vclamps-f32 %v3921_v4, 30.0  ;;  %v4830_v14 = vclamps-f32 %v3962_v5, 30.0  ;;  %v4190_v15 = vsub.f32 0.0, %v4827_v10 }
 0x4b4   :  { %4398 = vst [vmem:[%s5926_s9 + $0x20] sm:$0xff] %v4855_v9  ;;  %v4192_v20 = vsub.f32 0.0, %v4829_v26 }
 0x4b5   :  { %4399 = vst [vmem:[%s5926_s9 + $0x28] sm:$0xff] %v4856_v3  ;;  %v4191_v21 = vsub.f32 0.0, %v4828_v13  ;;  %v4193_v22 = vsub.f32 0.0, %v4830_v14  ;;  %v4226_v23 = vmul.f32 1.442695, %v4190_v15  ;;  %v2641_v14 = vrot.slane %v5881_v35, %v5823_v16 }
 0x4b6   :  { %v4230_v62 = vmul.f32 1.442695, %v4192_v20  ;;  %v2649_v15 = vrot.slane %v5881_v35, %v5825_v17  ;;  %v2645_v20 = vrot.slane %v5881_v35, %v5827_v18 }
 0x4b7   :  { %v4228_v24 = vmul.f32 1.442695, %v4191_v21  ;;  %v4232_v25 = vmul.f32 1.442695, %v4193_v22  ;;  %5450 = vpow2.f32 %v4226_v23  ;;  %v2653_v21 = vrot.slane %v5881_v35, %v5829_v19 }
 0x4b8   :  { %5452 = vpow2.f32 %v4230_v62 }
 0x4b9   :  { %5454 = vpow2.f32 %v4228_v24 }
 0x4ba   :  { %5456 = vpow2.f32 %v4232_v25 }
 0x4c1   :  { %v5451_v27 = vpop.eup %5450 }
 0x4c2   :  { %v5453_v28 = vpop.eup %5452  ;;  %v4262_v29 = vadd.f32 1.0, %v5451_v27 }
 0x4c3   :  { %v5455_v30 = vpop.eup %5454  ;;  %v4264_v31 = vadd.f32 1.0, %v5453_v28 }
 0x4c4   :  { %v5457_v32 = vpop.eup %5456  ;;  %5458 = vrcp.f32 %v4262_v29  ;;  %v4263_v33 = vadd.f32 1.0, %v5455_v30 }
 0x4c5   :  { %5460 = vrcp.f32 %v4264_v31  ;;  %v4265_v34 = vadd.f32 1.0, %v5457_v32 }
 0x4c6   :  { %5462 = vrcp.f32 %v4263_v33 }
 0x4c7   :  { %5464 = vrcp.f32 %v4265_v34 }
 0x4ce   :  { %v5459_v40 = vpop.eup %5458  ;;  %v4000_v46 = vpop.f32.mrb[44].mxu0 }
 0x4cf   :  { %v4041_v47 = vpop.f32.mrb[44].mxu1  ;;  %v5461_v42 = vpop.eup %5460  ;;  %v4001_v48 = vadd.f32 %v4000_v46, %v2625_v36 }
 0x4d0   :  { %v4042_v49 = vadd.f32 %v4041_v47, %v2633_v37  ;;  %v4002_v50 = vpop.f32.mrb[45].mxu0  ;;  %v4043_v51 = vpop.f32.mrb[45].mxu1 }
 0x4d1   :  { %v5463_v52 = vpop.eup %5462  ;;  %v4003_v53 = vadd.f32 %v4002_v50, %v2629_v38  ;;  %v4044_v39 = vadd.f32 %v4043_v51, %v2637_v45  ;;  %v4004_v54 = vpop.f32.mrb[46].mxu0  ;;  %v4831_v57 = vclamps-f32 %v4001_v48, 30.0 }
 0x4d2   :  { %v4045_v55 = vpop.f32.mrb[46].mxu1  ;;  %v5465_v41 = vpop.eup %5464  ;;  %v4857_v56 = vpack.c.bf16 %v5463_v52, %v5459_v40  ;;  %v4833_v43 = vclamps-f32 %v4042_v49, 30.0 }
 0x4d3   :  { %v4005_v58 = vpop.f32.mrb[47].mxu0  ;;  %v4046_v59 = vpop.f32.mrb[47].mxu1  ;;  %v4858_v44 = vpack.c.bf16 %v5465_v41, %v5461_v42  ;;  %v4832_v60 = vclamps-f32 %v4003_v53, 30.0  ;;  %v4834_v61 = vclamps-f32 %v4044_v39, 30.0  ;;  %v4194_v63 = vsub.f32 0.0, %v4831_v57 }
 0x4d4   :  { %4400 = vst [vmem:[%s5926_s9 + $0x30] sm:$0xff] %v4857_v56  ;;  %v4196_v0 = vsub.f32 0.0, %v4833_v43 }
 0x4d5   :  { %4401 = vst [vmem:[%s5926_s9 + $0x38] sm:$0xff] %v4858_v44  ;;  %v4195_v1 = vsub.f32 0.0, %v4832_v60  ;;  %v4197_v2 = vsub.f32 0.0, %v4834_v61  ;;  %v4234_v4 = vmul.f32 1.442695, %v4194_v63 }
 0x4d6   :  { %v4238_v5 = vmul.f32 1.442695, %v4196_v0 }
 0x4d7   :  { %v4236_v6 = vmul.f32 1.442695, %v4195_v1  ;;  %v4240_v7 = vmul.f32 1.442695, %v4197_v2  ;;  %5466 = vpow2.f32 %v4234_v4 }
 0x4d8   :  { %5468 = vpow2.f32 %v4238_v5 }
 0x4d9   :  { %5470 = vpow2.f32 %v4236_v6 }
 0x4da   :  { %5472 = vpow2.f32 %v4240_v7 }
 0x4e1   :  { %v5467_v8 = vpop.eup %5466 }
 0x4e2   :  { %v5469_v9 = vpop.eup %5468  ;;  %v4266_v10 = vadd.f32 1.0, %v5467_v8 }
 0x4e3   :  { %v5471_v26 = vpop.eup %5470  ;;  %v4268_v11 = vadd.f32 1.0, %v5469_v9 }
 0x4e4   :  { %v5473_v12 = vpop.eup %5472  ;;  %5474 = vrcp.f32 %v4266_v10  ;;  %v4267_v3 = vadd.f32 1.0, %v5471_v26 }
 0x4e5   :  { %5476 = vrcp.f32 %v4268_v11  ;;  %v4269_v13 = vadd.f32 1.0, %v5473_v12 }
 0x4e6   :  { %5478 = vrcp.f32 %v4267_v3 }
 0x4e7   :  { %5480 = vrcp.f32 %v4269_v13 }
 0x4ee   :  { %v5475_v22 = vpop.eup %5474  ;;  %v4082_v23 = vpop.f32.mrb[48].mxu0 }
 0x4ef   :  { %v4123_v62 = vpop.f32.mrb[48].mxu1  ;;  %v5477_v24 = vpop.eup %5476  ;;  %v4083_v25 = vadd.f32 %v4082_v23, %v2641_v14 }
 0x4f0   :  { %v4124_v27 = vadd.f32 %v4123_v62, %v2649_v15  ;;  %v4084_v28 = vpop.f32.mrb[49].mxu0  ;;  %v4125_v29 = vpop.f32.mrb[49].mxu1 }
 0x4f1   :  { %v5479_v30 = vpop.eup %5478  ;;  %v4085_v31 = vadd.f32 %v4084_v28, %v2645_v20  ;;  %v4126_v16 = vadd.f32 %v4125_v29, %v2653_v21  ;;  %v4086_v32 = vpop.f32.mrb[50].mxu0  ;;  %v4835_v36 = vclamps-f32 %v4083_v25, 30.0 }
 0x4f2   :  { %v4127_v33 = vpop.f32.mrb[50].mxu1  ;;  %v5481_v17 = vpop.eup %5480  ;;  %v4859_v34 = vpack.c.bf16 %v5479_v30, %v5475_v22  ;;  %v4837_v18 = vclamps-f32 %v4124_v27, 30.0 }
 0x4f3   :  { %v4087_v37 = vpop.f32.mrb[51].mxu0  ;;  %v4128_v38 = vpop.f32.mrb[51].mxu1  ;;  %v4860_v19 = vpack.c.bf16 %v5481_v17, %v5477_v24  ;;  %v4836_v35 = vclamps-f32 %v4085_v31, 30.0  ;;  %v4838_v45 = vclamps-f32 %v4126_v16, 30.0  ;;  %v4198_v40 = vsub.f32 0.0, %v4835_v36 }
 0x4f4   :  { %4402 = vst [vmem:[%s5926_s9 + $0x40] sm:$0xff] %v4859_v34  ;;  %v4200_v46 = vsub.f32 0.0, %v4837_v18 }
 0x4f5   :  { %4403 = vst [vmem:[%s5926_s9 + $0x48] sm:$0xff] %v4860_v19  ;;  %v4199_v47 = vsub.f32 0.0, %v4836_v35  ;;  %v4201_v42 = vsub.f32 0.0, %v4838_v45  ;;  %v4242_v48 = vmul.f32 1.442695, %v4198_v40 }
 0x4f6   :  { %v4246_v49 = vmul.f32 1.442695, %v4200_v46 }
 0x4f7   :  { %v4244_v50 = vmul.f32 1.442695, %v4199_v47  ;;  %v4248_v51 = vmul.f32 1.442695, %v4201_v42  ;;  %5482 = vpow2.f32 %v4242_v48 }
 0x4f8   :  { %5484 = vpow2.f32 %v4246_v49 }
 0x4f9   :  { %5486 = vpow2.f32 %v4244_v50 }
 0x4fa   :  { %5488 = vpow2.f32 %v4248_v51 }
 0x501   :  { %v5483_v52 = vpop.eup %5482 }
 0x502   :  { %v5485_v53 = vpop.eup %5484  ;;  %v4270_v39 = vadd.f32 1.0, %v5483_v52 }
 0x503   :  { %v5487_v54 = vpop.eup %5486  ;;  %v4272_v55 = vadd.f32 1.0, %v5485_v53 }
 0x504   :  { %v5489_v41 = vpop.eup %5488  ;;  %5490 = vrcp.f32 %v4270_v39  ;;  %v4271_v56 = vadd.f32 1.0, %v5487_v54 }
 0x505   :  { %5492 = vrcp.f32 %v4272_v55  ;;  %v4273_v57 = vadd.f32 1.0, %v5489_v41 }
 0x506   :  { %5494 = vrcp.f32 %v4271_v56 }
 0x507   :  { %5496 = vrcp.f32 %v4273_v57 }
 0x50e   :  { %v5491_v43 = vpop.eup %5490 }
 0x50f   :  { %v5493_v58 = vpop.eup %5492 }
 0x510   :  { %v5495_v59 = vpop.eup %5494 }
 0x511   :  { %v5497_v44 = vpop.eup %5496  ;;  %v4861_v60 = vpack.c.bf16 %v5495_v59, %v5491_v43 }
 0x512   :  { %v4862_v61 = vpack.c.bf16 %v5497_v44, %v5493_v58 }
 0x513   :  { %4404 = vst [vmem:[%s5926_s9 + $0x50] sm:$0xff] %v4861_v60 }
 0x514   :  { %4405 = vst [vmem:[%s5926_s9 + $0x58] sm:$0xff] %v4862_v61 }
 0x515   :  { %4410 = vsyncpa [#allocation3], 1 }
 0x516   :  { %4411 = vsyncpa [#allocation5], 1 }

</bundles_post_ra>
